<compile_context>
chip_gen: v5e
topology: v5e:2x2
jax: 0.10.0
libtpu: 0.0.40
codegen_flags: <defaults>
</compile_context>

<pallas_src>
import functools

import numpy as np
import jax
import jax.numpy as jnp
from jax.experimental import pallas as pl
from jax.experimental.pallas import tpu as pltpu


# --------------------------------------------------------------- fused kernel

def _discriminator_kernel(*refs, cfg):
    """Whole forward pass for ONE sample (grid iterates over batch).

    refs = (x, <per-layer constants...>, out, <per-layer G scratch...>)
    Per-layer constants: btap, mcat, [bias], [cs, cb].
    cfg[l] = (kh, wc_in, h_out, w_out, c_out, has_bias, use_norm, use_act).
    Activation layout: rows = image row, cols = (col, channel).
    """
    n_layers = len(cfg)
    x_ref = refs[0]
    out_ref = refs[-(1 + n_layers)]
    scratch_refs = refs[-n_layers:]
    layer_refs = refs[1:-(1 + n_layers)]

    a = x_ref[0]                                    # (h_in, w_in*c_in)
    p = 0
    for li, (kh, wc_in, h_out, w_out, c_out, has_bias, use_norm, use_act) in enumerate(cfg):
        b_ref = layer_refs[p]; p += 1               # (kh, h_out, h_in) 0/1 gathers
        m_ref = layer_refs[p]; p += 1               # (kh*w_in*c_in, w_out*c_out)
        bias_ref = None
        if has_bias:
            bias_ref = layer_refs[p]; p += 1        # (1, w_out*c_out)
        cs_ref = cb_ref = None
        if use_norm:
            cs_ref = layer_refs[p]; p += 1          # (w_out*c_out, c_out)
            cb_ref = layer_refs[p]; p += 1          # (c_out, w_out*c_out)

        # Conv: gather the kh vertical taps into column blocks of G, then one
        # deep matmul with the folded (weights x horizontal-im2col) matrix.
        g_ref = scratch_refs[li]                    # (h_out, kh*wc_in)
        for i in range(kh):
            g_ref[:, i * wc_in:(i + 1) * wc_in] = jnp.dot(
                b_ref[i], a, preferred_element_type=jnp.float32)
        acc = jnp.dot(g_ref[...], m_ref[...],
                      preferred_element_type=jnp.float32)   # (h_out, w_out*c_out)

        if bias_ref is not None:
            acc = acc + bias_ref[...]

        if use_norm:
            # InstanceNorm2d (affine=False, biased var, eps=1e-5), per channel.
            inv_cnt = 1.0 / float(h_out * w_out)
            row_sum = jnp.sum(acc, axis=0, keepdims=True)        # (1, w_out*c_out)
            row_sq = jnp.sum(acc * acc, axis=0, keepdims=True)
            mean_c = jnp.dot(row_sum, cs_ref[...],
                             preferred_element_type=jnp.float32) * inv_cnt  # (1, c_out)
            ex2_c = jnp.dot(row_sq, cs_ref[...],
                            preferred_element_type=jnp.float32) * inv_cnt
            var_c = ex2_c - mean_c * mean_c
            inv_std_c = jax.lax.rsqrt(var_c + 1e-5)
            mean_b = jnp.dot(mean_c, cb_ref[...],
                             preferred_element_type=jnp.float32)            # (1, w_out*c_out)
            inv_std_b = jnp.dot(inv_std_c, cb_ref[...],
                                preferred_element_type=jnp.float32)
            acc = (acc - mean_b) * inv_std_b

        if use_act:
            acc = jnp.where(acc > 0, acc, 0.2 * acc)

        a = acc

    out_ref[0] = a


# ------------------------------------------------------ trace-time constants

def _tap_gather_const(kh, h_in, h_out, stride, pad):
    """(kh, h_out, h_in) 0/1 matrices: B[i] @ A gathers vertical tap i
    (zero rows where the tap falls into padding)."""
    B = np.zeros((kh, h_out, h_in), np.float32)
    for i in range(kh):
        for ho in range(h_out):
            src = stride * ho - pad + i
            if 0 <= src < h_in:
                B[i, ho, src] = 1.0
    return B


def _chan_reduce_consts(w_out, c_out):
    """cs (w_out*c_out, c_out): sums the w_out spatial copies per channel.
       cb (c_out, w_out*c_out): broadcasts one value per channel back."""
    cols = w_out * c_out
    cs = np.zeros((cols, c_out), np.float32)
    cb = np.zeros((c_out, cols), np.float32)
    for wo in range(w_out):
        for co in range(c_out):
            cs[wo * c_out + co, co] = 1.0
            cb[co, wo * c_out + co] = 1.0
    return cs, cb


def _col_mixer(w_oihw, w_in, stride, pad):
    """Fold weights + horizontal im2col (+ zero padding) into one matrix.

    Returns Mcat of shape (kh*w_in*c_in, w_out*c_out) with
      Mcat[i*w_in*c_in + w*c_in + ci, wo*c_out + co] = W[co, ci, i, w-(stride*wo-pad)]
    whenever that kernel tap is in range, else 0.
    """
    c_out, c_in, kh, kw = w_oihw.shape
    w_out = (w_in + 2 * pad - kw) // stride + 1
    p = np.zeros((kw, w_in, w_out), np.float32)
    for j in range(kw):
        for wo in range(w_out):
            wsrc = stride * wo - pad + j
            if 0 <= wsrc < w_in:
                p[j, wsrc, wo] = 1.0
    wt = jnp.transpose(w_oihw, (2, 3, 1, 0)).astype(jnp.float32)     # (KH,KW,Cin,Cout)
    m = jnp.einsum('jwz,ijcd->iwczd', jnp.asarray(p), wt)            # (KH,Win,Cin,Wout,Cout)
    return m.reshape(kh * w_in * c_in, w_out * c_out), w_out


# --------------------------------------------------------------------- wrapper

def discriminator_forward(params, x_nchw):
    n, c0, h, w = x_nchw.shape
    assert h == w, "square inputs expected"

    # (weight, bias, stride, pad, use_norm, use_act)
    layer_defs = [(params["w0"], params["b0"], 2, 1, False, True)]
    for wgt, _bias in params["layers"]:
        # Bias dropped: InstanceNorm (affine=False) subtracts the per-channel
        # mean, which cancels a per-channel bias exactly.
        layer_defs.append((wgt, None, 2, 1, True, True))
    layer_defs.append((params["w_src"], None, 1, 1, False, False))

    # Input -> (N, H, W*Cin) layout; grid iterates over N (one sample / block).
    x3d = jnp.transpose(x_nchw, (0, 2, 3, 1)).reshape(n, h, w * c0).astype(jnp.float32)

    def _const_spec(shape):
        nd = len(shape)
        return pl.BlockSpec(shape, lambda b: (0,) * nd)

    inputs = [x3d]
    in_specs = [pl.BlockSpec((1, h, w * c0), lambda b: (b, 0, 0))]
    scratch_shapes = []
    cfg = []
    flops = 0
    trans = 0

    h_in, c_in = h, c0
    for wgt, bias, stride, pad, use_norm, use_act in layer_defs:
        c_out, c_in_w, kh, _kw = wgt.shape
        assert c_in_w == c_in
        wc_in = h_in * c_in                               # w_in == h_in (square)
        mcat, w_out = _col_mixer(wgt, h_in, stride, pad)
        h_out = w_out
        btap = jnp.asarray(_tap_gather_const(kh, h_in, h_out, stride, pad))

        inputs += [btap, mcat]
        in_specs += [_const_spec(btap.shape), _const_spec(mcat.shape)]

        has_bias = bias is not None
        if has_bias:
            b2d = jnp.tile(bias.astype(jnp.float32), w_out).reshape(1, w_out * c_out)
            inputs.append(b2d)
            in_specs.append(_const_spec(b2d.shape))
        if use_norm:
            cs, cb = _chan_reduce_consts(w_out, c_out)
            inputs += [jnp.asarray(cs), jnp.asarray(cb)]
            in_specs += [_const_spec(cs.shape), _const_spec(cb.shape)]
            trans += c_out

        scratch_shapes.append(pltpu.VMEM((h_out, kh * wc_in), jnp.float32))
        cfg.append((kh, wc_in, h_out, w_out, c_out, has_bias, use_norm, use_act))

        flops += 2 * kh * h_out * h_in * wc_in                    # tap gathers
        flops += 2 * h_out * (kh * wc_in) * (w_out * c_out)       # fused conv matmul
        h_in, c_in = h_out, c_out

    flops *= n
    trans *= n
    out_elems = n * h_in * h_in * c_in
    bytes_accessed = sum(int(np.prod(a.shape)) * 4 for a in inputs) + out_elems * 4

    out_shape = jax.ShapeDtypeStruct((n, h_in, h_in * c_in), jnp.float32)
    out_spec = pl.BlockSpec((1, h_in, h_in * c_in), lambda b: (b, 0, 0))

    out3d = pl.pallas_call(
        functools.partial(_discriminator_kernel, cfg=tuple(cfg)),
        out_shape=out_shape,
        grid=(n,),
        in_specs=in_specs,
        out_specs=out_spec,
        scratch_shapes=scratch_shapes,
        compiler_params=pltpu.CompilerParams(
            dimension_semantics=("parallel",)),
        cost_estimate=pl.CostEstimate(
            flops=int(flops), transcendentals=int(trans),
            bytes_accessed=int(bytes_accessed)),
    )(*inputs)

    out = out3d.reshape(n, h_in, h_in, c_in)             # (N, Hf, Wf, 1)
    return jnp.transpose(out, (0, 3, 1, 2))              # -> NCHW


# --------------------------------------------------------------------- params

def init_params(key, conv_dim, layer_num):
    params = {}
    k = key
    cin = 3

    def _w(key, cout, cin, kh, kw):
        return 0.05 * jax.random.normal(key, (cout, cin, kh, kw), jnp.float32)

    k, k1, k2 = jax.random.split(k, 3)
    params["w0"] = _w(k1, conv_dim, cin, 4, 4)
    params["b0"] = 0.05 * jax.random.normal(k2, (conv_dim,), jnp.float32)

    cur = conv_dim
    params["layers"] = []
    for _ in range(layer_num):
        k, k1, k2 = jax.random.split(k, 3)
        params["layers"].append(
            (_w(k1, cur * 2, cur, 4, 4),
             0.05 * jax.random.normal(k2, (cur * 2,), jnp.float32)))
        cur *= 2

    k, k1 = jax.random.split(k)
    params["w_src"] = _w(k1, 1, cur, 3, 3)   # conv_src: bias=False
    return params


# ----------------------------------------------------------- pure-JAX reference

def _reference_forward(params, x_nchw):
    def conv(x, wgt, b, stride, pad):
        y = jax.lax.conv_general_dilated(
            x, wgt, window_strides=(stride, stride),
            padding=[(pad, pad), (pad, pad)],
            dimension_numbers=('NCHW', 'OIHW', 'NCHW'),
            precision=jax.lax.Precision.HIGHEST)
        if b is not None:
            y = y + b.reshape(1, -1, 1, 1)
        return y

    def lrelu(x):
        return jnp.where(x > 0, x, 0.2 * x)

    def inorm(x):
        mean = jnp.mean(x, axis=(2, 3), keepdims=True)
        var = jnp.mean((x - mean) ** 2, axis=(2, 3), keepdims=True)
        return (x - mean) * jax.lax.rsqrt(var + 1e-5)

    h = lrelu(conv(x_nchw, params["w0"], params["b0"], 2, 1))
    for wgt, b in params["layers"]:
        h = lrelu(inorm(conv(h, wgt, b, 2, 1)))
    return conv(h, params["w_src"], None, 1, 1)


# ------------------------------------------------------------------------ main

if __name__ == "__main__":
    image_size, conv_dim, layer_num = 16, 8, 2
    batch = 2

    key = jax.random.PRNGKey(0)
    k_x, k_p = jax.random.split(key)
    x = jax.random.normal(k_x, (batch, 3, image_size, image_size), jnp.float32)
    params = init_params(k_p, conv_dim, layer_num)

    fwd = jax.jit(discriminator_forward)
    out = jax.block_until_ready(fwd(params, x))

    # PatchGAN output: (batch, 1, image_size / 2**(layer_num+1), same)
    expected = (batch, 1, image_size // (2 ** (layer_num + 1)),
                image_size // (2 ** (layer_num + 1)))
    assert out.shape == expected, (out.shape, expected)
    assert bool(jnp.all(jnp.isfinite(out)))

    ref = jax.block_until_ready(_reference_forward(params, x))
    err = float(jnp.max(jnp.abs(out - ref)))
    assert jnp.allclose(out, ref, rtol=2e-3, atol=2e-3), err

    print("KERNEL_OK")
</pallas_src>

<mosaic_0001>
module attributes {stable_mosaic.version = 11 : i64} {
  func.func @_discriminator_kernel(%arg0: i32, %arg1: memref<1x16x48xf32, #tpu.memory_space<vmem>>, %arg2: memref<4x8x16xf32, #tpu.memory_space<vmem>>, %arg3: memref<192x64xf32, #tpu.memory_space<vmem>>, %arg4: memref<1x64xf32, #tpu.memory_space<vmem>>, %arg5: memref<4x4x8xf32, #tpu.memory_space<vmem>>, %arg6: memref<256x64xf32, #tpu.memory_space<vmem>>, %arg7: memref<64x16xf32, #tpu.memory_space<vmem>>, %arg8: memref<16x64xf32, #tpu.memory_space<vmem>>, %arg9: memref<4x2x4xf32, #tpu.memory_space<vmem>>, %arg10: memref<256x64xf32, #tpu.memory_space<vmem>>, %arg11: memref<64x32xf32, #tpu.memory_space<vmem>>, %arg12: memref<32x64xf32, #tpu.memory_space<vmem>>, %arg13: memref<3x2x2xf32, #tpu.memory_space<vmem>>, %arg14: memref<192x2xf32, #tpu.memory_space<vmem>>, %arg15: memref<1x2x2xf32, #tpu.memory_space<vmem>>, %arg16: memref<8x192xf32, #tpu.memory_space<vmem>>, %arg17: memref<4x256xf32, #tpu.memory_space<vmem>>, %arg18: memref<2x256xf32, #tpu.memory_space<vmem>>, %arg19: memref<2x192xf32, #tpu.memory_space<vmem>>) attributes {dimension_semantics = [#tpu.dimension_semantics<parallel>], iteration_bounds = array<i64: 2>, scalar_prefetch = 0 : i64, scratch_operands = 4 : i64, tpu.core_type = #tpu.core_type<tc>, window_params = [{transform_indices = @transform_0, window_bounds = array<i64: 1, 16, 48>}, {pipeline_mode = #tpu.pipeline_mode<synchronous>, transform_indices = @transform_1, window_bounds = array<i64: 4, 8, 16>}, {pipeline_mode = #tpu.pipeline_mode<synchronous>, transform_indices = @transform_2, window_bounds = array<i64: 192, 64>}, {pipeline_mode = #tpu.pipeline_mode<synchronous>, transform_indices = @transform_3, window_bounds = array<i64: 1, 64>}, {pipeline_mode = #tpu.pipeline_mode<synchronous>, transform_indices = @transform_4, window_bounds = array<i64: 4, 4, 8>}, {pipeline_mode = #tpu.pipeline_mode<synchronous>, transform_indices = @transform_5, window_bounds = array<i64: 256, 64>}, {pipeline_mode = #tpu.pipeline_mode<synchronous>, transform_indices = @transform_6, window_bounds = array<i64: 64, 16>}, {pipeline_mode = #tpu.pipeline_mode<synchronous>, transform_indices = @transform_7, window_bounds = array<i64: 16, 64>}, {pipeline_mode = #tpu.pipeline_mode<synchronous>, transform_indices = @transform_8, window_bounds = array<i64: 4, 2, 4>}, {pipeline_mode = #tpu.pipeline_mode<synchronous>, transform_indices = @transform_9, window_bounds = array<i64: 256, 64>}, {pipeline_mode = #tpu.pipeline_mode<synchronous>, transform_indices = @transform_10, window_bounds = array<i64: 64, 32>}, {pipeline_mode = #tpu.pipeline_mode<synchronous>, transform_indices = @transform_11, window_bounds = array<i64: 32, 64>}, {pipeline_mode = #tpu.pipeline_mode<synchronous>, transform_indices = @transform_12, window_bounds = array<i64: 3, 2, 2>}, {pipeline_mode = #tpu.pipeline_mode<synchronous>, transform_indices = @transform_13, window_bounds = array<i64: 192, 2>}, {transform_indices = @transform_14, window_bounds = array<i64: 1, 2, 2>}]} {
    %c0 = arith.constant 0 : index
    %c0_0 = arith.constant 0 : index
    %c0_1 = arith.constant 0 : index
    %0 = vector.load %arg1[%c0, %c0_0, %c0_1] : memref<1x16x48xf32, #tpu.memory_space<vmem>>, vector<1x16x48xf32>
    %1 = vector.shape_cast %0 : vector<1x16x48xf32> to vector<16x48xf32>
    %c0_2 = arith.constant 0 : index
    %c0_3 = arith.constant 0 : index
    %c0_4 = arith.constant 0 : index
    %2 = vector.load %arg2[%c0_2, %c0_3, %c0_4] : memref<4x8x16xf32, #tpu.memory_space<vmem>>, vector<1x8x16xf32>
    %3 = vector.shape_cast %2 : vector<1x8x16xf32> to vector<8x16xf32>
    %cst = arith.constant dense<0.000000e+00> : vector<8x48xf32>
    %4 = tpu.matmul %3, %1, %cst {dimension_numbers = #tpu.dot_dimension_numbers<[1], [0], [0], [1], [0, 0, 1, 1], [], []>} : vector<8x16xf32>, vector<16x48xf32>, vector<8x48xf32> -> vector<8x48xf32>
    %c0_5 = arith.constant 0 : index
    %c0_6 = arith.constant 0 : index
    %5 = vector.load %arg16[%c0_5, %c0_6] : memref<8x192xf32, #tpu.memory_space<vmem>>, vector<8x48xf32>
    tpu.vector_store %arg16[%c0_5, %c0_6], %4 {strides = array<i32>} : memref<8x192xf32, #tpu.memory_space<vmem>>, vector<8x48xf32>,
    %c1 = arith.constant 1 : index
    %c0_7 = arith.constant 0 : index
    %c0_8 = arith.constant 0 : index
    %6 = vector.load %arg2[%c1, %c0_7, %c0_8] : memref<4x8x16xf32, #tpu.memory_space<vmem>>, vector<1x8x16xf32>
    %7 = vector.shape_cast %6 : vector<1x8x16xf32> to vector<8x16xf32>
    %cst_9 = arith.constant dense<0.000000e+00> : vector<8x48xf32>
    %8 = tpu.matmul %7, %1, %cst_9 {dimension_numbers = #tpu.dot_dimension_numbers<[1], [0], [0], [1], [0, 0, 1, 1], [], []>} : vector<8x16xf32>, vector<16x48xf32>, vector<8x48xf32> -> vector<8x48xf32>
    %c0_10 = arith.constant 0 : index
    %c48 = arith.constant 48 : index
    %9 = vector.load %arg16[%c0_10, %c48] : memref<8x192xf32, #tpu.memory_space<vmem>>, vector<8x48xf32>
    tpu.vector_store %arg16[%c0_10, %c48], %8 {strides = array<i32>} : memref<8x192xf32, #tpu.memory_space<vmem>>, vector<8x48xf32>,
    %c2 = arith.constant 2 : index
    %c0_11 = arith.constant 0 : index
    %c0_12 = arith.constant 0 : index
    %10 = vector.load %arg2[%c2, %c0_11, %c0_12] : memref<4x8x16xf32, #tpu.memory_space<vmem>>, vector<1x8x16xf32>
    %11 = vector.shape_cast %10 : vector<1x8x16xf32> to vector<8x16xf32>
    %cst_13 = arith.constant dense<0.000000e+00> : vector<8x48xf32>
    %12 = tpu.matmul %11, %1, %cst_13 {dimension_numbers = #tpu.dot_dimension_numbers<[1], [0], [0], [1], [0, 0, 1, 1], [], []>} : vector<8x16xf32>, vector<16x48xf32>, vector<8x48xf32> -> vector<8x48xf32>
    %c0_14 = arith.constant 0 : index
    %c96 = arith.constant 96 : index
    %13 = vector.load %arg16[%c0_14, %c96] : memref<8x192xf32, #tpu.memory_space<vmem>>, vector<8x48xf32>
    tpu.vector_store %arg16[%c0_14, %c96], %12 {strides = array<i32>} : memref<8x192xf32, #tpu.memory_space<vmem>>, vector<8x48xf32>,
    %c3 = arith.constant 3 : index
    %c0_15 = arith.constant 0 : index
    %c0_16 = arith.constant 0 : index
    %14 = vector.load %arg2[%c3, %c0_15, %c0_16] : memref<4x8x16xf32, #tpu.memory_space<vmem>>, vector<1x8x16xf32>
    %15 = vector.shape_cast %14 : vector<1x8x16xf32> to vector<8x16xf32>
    %cst_17 = arith.constant dense<0.000000e+00> : vector<8x48xf32>
    %16 = tpu.matmul %15, %1, %cst_17 {dimension_numbers = #tpu.dot_dimension_numbers<[1], [0], [0], [1], [0, 0, 1, 1], [], []>} : vector<8x16xf32>, vector<16x48xf32>, vector<8x48xf32> -> vector<8x48xf32>
    %c0_18 = arith.constant 0 : index
    %c144 = arith.constant 144 : index
    %17 = vector.load %arg16[%c0_18, %c144] : memref<8x192xf32, #tpu.memory_space<vmem>>, vector<8x48xf32>
    tpu.vector_store %arg16[%c0_18, %c144], %16 {strides = array<i32>} : memref<8x192xf32, #tpu.memory_space<vmem>>, vector<8x48xf32>,
    %c0_19 = arith.constant 0 : index
    %c0_20 = arith.constant 0 : index
    %18 = vector.load %arg16[%c0_19, %c0_20] : memref<8x192xf32, #tpu.memory_space<vmem>>, vector<8x192xf32>
    %c0_21 = arith.constant 0 : index
    %c0_22 = arith.constant 0 : index
    %19 = vector.load %arg3[%c0_21, %c0_22] : memref<192x64xf32, #tpu.memory_space<vmem>>, vector<192x64xf32>
    %cst_23 = arith.constant dense<0.000000e+00> : vector<8x64xf32>
    %20 = tpu.matmul %18, %19, %cst_23 {dimension_numbers = #tpu.dot_dimension_numbers<[1], [0], [0], [1], [0, 0, 1, 1], [], []>} : vector<8x192xf32>, vector<192x64xf32>, vector<8x64xf32> -> vector<8x64xf32>
    %c0_24 = arith.constant 0 : index
    %c0_25 = arith.constant 0 : index
    %21 = vector.load %arg4[%c0_24, %c0_25] : memref<1x64xf32, #tpu.memory_space<vmem>>, vector<1x64xf32>
    %22 = vector.broadcast %21 : vector<1x64xf32> to vector<8x64xf32>
    %23 = arith.addf %20, %22 : vector<8x64xf32>
    %cst_26 = arith.constant 0.000000e+00 : f32
    %24 = vector.broadcast %cst_26 : f32 to vector<8x64xf32>
    %25 = arith.cmpf ogt, %23, %24 : vector<8x64xf32>
    %cst_27 = arith.constant 2.000000e-01 : f32
    %26 = vector.broadcast %cst_27 : f32 to vector<8x64xf32>
    %27 = arith.mulf %26, %23 : vector<8x64xf32>
    %28 = arith.select %25, %23, %27 : vector<8x64xi1>, vector<8x64xf32>
    %c0_28 = arith.constant 0 : index
    %c0_29 = arith.constant 0 : index
    %c0_30 = arith.constant 0 : index
    %29 = vector.load %arg5[%c0_28, %c0_29, %c0_30] : memref<4x4x8xf32, #tpu.memory_space<vmem>>, vector<1x4x8xf32>
    %30 = vector.shape_cast %29 : vector<1x4x8xf32> to vector<4x8xf32>
    %cst_31 = arith.constant dense<0.000000e+00> : vector<4x64xf32>
    %31 = tpu.matmul %30, %28, %cst_31 {dimension_numbers = #tpu.dot_dimension_numbers<[1], [0], [0], [1], [0, 0, 1, 1], [], []>} : vector<4x8xf32>, vector<8x64xf32>, vector<4x64xf32> -> vector<4x64xf32>
    %c0_32 = arith.constant 0 : index
    %c0_33 = arith.constant 0 : index
    %32 = vector.load %arg17[%c0_32, %c0_33] : memref<4x256xf32, #tpu.memory_space<vmem>>, vector<4x64xf32>
    tpu.vector_store %arg17[%c0_32, %c0_33], %31 {strides = array<i32>} : memref<4x256xf32, #tpu.memory_space<vmem>>, vector<4x64xf32>,
    %c1_34 = arith.constant 1 : index
    %c0_35 = arith.constant 0 : index
    %c0_36 = arith.constant 0 : index
    %33 = vector.load %arg5[%c1_34, %c0_35, %c0_36] : memref<4x4x8xf32, #tpu.memory_space<vmem>>, vector<1x4x8xf32>
    %34 = vector.shape_cast %33 : vector<1x4x8xf32> to vector<4x8xf32>
    %cst_37 = arith.constant dense<0.000000e+00> : vector<4x64xf32>
    %35 = tpu.matmul %34, %28, %cst_37 {dimension_numbers = #tpu.dot_dimension_numbers<[1], [0], [0], [1], [0, 0, 1, 1], [], []>} : vector<4x8xf32>, vector<8x64xf32>, vector<4x64xf32> -> vector<4x64xf32>
    %c0_38 = arith.constant 0 : index
    %c64 = arith.constant 64 : index
    %36 = vector.load %arg17[%c0_38, %c64] : memref<4x256xf32, #tpu.memory_space<vmem>>, vector<4x64xf32>
    tpu.vector_store %arg17[%c0_38, %c64], %35 {strides = array<i32>} : memref<4x256xf32, #tpu.memory_space<vmem>>, vector<4x64xf32>,
    %c2_39 = arith.constant 2 : index
    %c0_40 = arith.constant 0 : index
    %c0_41 = arith.constant 0 : index
    %37 = vector.load %arg5[%c2_39, %c0_40, %c0_41] : memref<4x4x8xf32, #tpu.memory_space<vmem>>, vector<1x4x8xf32>
    %38 = vector.shape_cast %37 : vector<1x4x8xf32> to vector<4x8xf32>
    %cst_42 = arith.constant dense<0.000000e+00> : vector<4x64xf32>
    %39 = tpu.matmul %38, %28, %cst_42 {dimension_numbers = #tpu.dot_dimension_numbers<[1], [0], [0], [1], [0, 0, 1, 1], [], []>} : vector<4x8xf32>, vector<8x64xf32>, vector<4x64xf32> -> vector<4x64xf32>
    %c0_43 = arith.constant 0 : index
    %c128 = arith.constant 128 : index
    %40 = vector.load %arg17[%c0_43, %c128] : memref<4x256xf32, #tpu.memory_space<vmem>>, vector<4x64xf32>
    tpu.vector_store %arg17[%c0_43, %c128], %39 {strides = array<i32>} : memref<4x256xf32, #tpu.memory_space<vmem>>, vector<4x64xf32>,
    %c3_44 = arith.constant 3 : index
    %c0_45 = arith.constant 0 : index
    %c0_46 = arith.constant 0 : index
    %41 = vector.load %arg5[%c3_44, %c0_45, %c0_46] : memref<4x4x8xf32, #tpu.memory_space<vmem>>, vector<1x4x8xf32>
    %42 = vector.shape_cast %41 : vector<1x4x8xf32> to vector<4x8xf32>
    %cst_47 = arith.constant dense<0.000000e+00> : vector<4x64xf32>
    %43 = tpu.matmul %42, %28, %cst_47 {dimension_numbers = #tpu.dot_dimension_numbers<[1], [0], [0], [1], [0, 0, 1, 1], [], []>} : vector<4x8xf32>, vector<8x64xf32>, vector<4x64xf32> -> vector<4x64xf32>
    %c0_48 = arith.constant 0 : index
    %c192 = arith.constant 192 : index
    %44 = vector.load %arg17[%c0_48, %c192] : memref<4x256xf32, #tpu.memory_space<vmem>>, vector<4x64xf32>
    tpu.vector_store %arg17[%c0_48, %c192], %43 {strides = array<i32>} : memref<4x256xf32, #tpu.memory_space<vmem>>, vector<4x64xf32>,
    %c0_49 = arith.constant 0 : index
    %c0_50 = arith.constant 0 : index
    %45 = vector.load %arg17[%c0_49, %c0_50] : memref<4x256xf32, #tpu.memory_space<vmem>>, vector<4x256xf32>
    %c0_51 = arith.constant 0 : index
    %c0_52 = arith.constant 0 : index
    %46 = vector.load %arg6[%c0_51, %c0_52] : memref<256x64xf32, #tpu.memory_space<vmem>>, vector<256x64xf32>
    %cst_53 = arith.constant dense<0.000000e+00> : vector<4x64xf32>
    %47 = tpu.matmul %45, %46, %cst_53 {dimension_numbers = #tpu.dot_dimension_numbers<[1], [0], [0], [1], [0, 0, 1, 1], [], []>} : vector<4x256xf32>, vector<256x64xf32>, vector<4x64xf32> -> vector<4x64xf32>
    %cst_54 = arith.constant dense<0.000000e+00> : vector<64xf32>
    %48 = vector.multi_reduction <add>, %47, %cst_54 [0] : vector<4x64xf32> to vector<64xf32>
    %49 = vector.shape_cast %48 : vector<64xf32> to vector<1x64xf32>
    %50 = arith.mulf %47, %47 : vector<4x64xf32>
    %cst_55 = arith.constant dense<0.000000e+00> : vector<64xf32>
    %51 = vector.multi_reduction <add>, %50, %cst_55 [0] : vector<4x64xf32> to vector<64xf32>
    %52 = vector.shape_cast %51 : vector<64xf32> to vector<1x64xf32>
    %c0_56 = arith.constant 0 : index
    %c0_57 = arith.constant 0 : index
    %53 = vector.load %arg7[%c0_56, %c0_57] : memref<64x16xf32, #tpu.memory_space<vmem>>, vector<64x16xf32>
    %cst_58 = arith.constant dense<0.000000e+00> : vector<1x16xf32>
    %54 = tpu.matmul %49, %53, %cst_58 {dimension_numbers = #tpu.dot_dimension_numbers<[1], [0], [0], [1], [0, 0, 1, 1], [], []>} : vector<1x64xf32>, vector<64x16xf32>, vector<1x16xf32> -> vector<1x16xf32>
    %cst_59 = arith.constant 6.250000e-02 : f32
    %55 = vector.broadcast %cst_59 : f32 to vector<1x16xf32>
    %56 = arith.mulf %54, %55 : vector<1x16xf32>
    %c0_60 = arith.constant 0 : index
    %c0_61 = arith.constant 0 : index
    %57 = vector.load %arg7[%c0_60, %c0_61] : memref<64x16xf32, #tpu.memory_space<vmem>>, vector<64x16xf32>
    %cst_62 = arith.constant dense<0.000000e+00> : vector<1x16xf32>
    %58 = tpu.matmul %52, %57, %cst_62 {dimension_numbers = #tpu.dot_dimension_numbers<[1], [0], [0], [1], [0, 0, 1, 1], [], []>} : vector<1x64xf32>, vector<64x16xf32>, vector<1x16xf32> -> vector<1x16xf32>
    %cst_63 = arith.constant 6.250000e-02 : f32
    %59 = vector.broadcast %cst_63 : f32 to vector<1x16xf32>
    %60 = arith.mulf %58, %59 : vector<1x16xf32>
    %61 = arith.mulf %56, %56 : vector<1x16xf32>
    %62 = arith.subf %60, %61 : vector<1x16xf32>
    %cst_64 = arith.constant 9.99999974E-6 : f32
    %63 = vector.broadcast %cst_64 : f32 to vector<1x16xf32>
    %64 = arith.addf %62, %63 : vector<1x16xf32>
    %65 = math.rsqrt %64 : vector<1x16xf32>
    %c0_65 = arith.constant 0 : index
    %c0_66 = arith.constant 0 : index
    %66 = vector.load %arg8[%c0_65, %c0_66] : memref<16x64xf32, #tpu.memory_space<vmem>>, vector<16x64xf32>
    %cst_67 = arith.constant dense<0.000000e+00> : vector<1x64xf32>
    %67 = tpu.matmul %56, %66, %cst_67 {dimension_numbers = #tpu.dot_dimension_numbers<[1], [0], [0], [1], [0, 0, 1, 1], [], []>} : vector<1x16xf32>, vector<16x64xf32>, vector<1x64xf32> -> vector<1x64xf32>
    %c0_68 = arith.constant 0 : index
    %c0_69 = arith.constant 0 : index
    %68 = vector.load %arg8[%c0_68, %c0_69] : memref<16x64xf32, #tpu.memory_space<vmem>>, vector<16x64xf32>
    %cst_70 = arith.constant dense<0.000000e+00> : vector<1x64xf32>
    %69 = tpu.matmul %65, %68, %cst_70 {dimension_numbers = #tpu.dot_dimension_numbers<[1], [0], [0], [1], [0, 0, 1, 1], [], []>} : vector<1x16xf32>, vector<16x64xf32>, vector<1x64xf32> -> vector<1x64xf32>
    %70 = vector.broadcast %67 : vector<1x64xf32> to vector<4x64xf32>
    %71 = arith.subf %47, %70 : vector<4x64xf32>
    %72 = vector.broadcast %69 : vector<1x64xf32> to vector<4x64xf32>
    %73 = arith.mulf %71, %72 : vector<4x64xf32>
    %cst_71 = arith.constant 0.000000e+00 : f32
    %74 = vector.broadcast %cst_71 : f32 to vector<4x64xf32>
    %75 = arith.cmpf ogt, %73, %74 : vector<4x64xf32>
    %cst_72 = arith.constant 2.000000e-01 : f32
    %76 = vector.broadcast %cst_72 : f32 to vector<4x64xf32>
    %77 = arith.mulf %76, %73 : vector<4x64xf32>
    %78 = arith.select %75, %73, %77 : vector<4x64xi1>, vector<4x64xf32>
    %c0_73 = arith.constant 0 : index
    %c0_74 = arith.constant 0 : index
    %c0_75 = arith.constant 0 : index
    %79 = vector.load %arg9[%c0_73, %c0_74, %c0_75] : memref<4x2x4xf32, #tpu.memory_space<vmem>>, vector<1x2x4xf32>
    %80 = vector.shape_cast %79 : vector<1x2x4xf32> to vector<2x4xf32>
    %cst_76 = arith.constant dense<0.000000e+00> : vector<2x64xf32>
    %81 = tpu.matmul %80, %78, %cst_76 {dimension_numbers = #tpu.dot_dimension_numbers<[1], [0], [0], [1], [0, 0, 1, 1], [], []>} : vector<2x4xf32>, vector<4x64xf32>, vector<2x64xf32> -> vector<2x64xf32>
    %c0_77 = arith.constant 0 : index
    %c0_78 = arith.constant 0 : index
    %82 = vector.load %arg18[%c0_77, %c0_78] : memref<2x256xf32, #tpu.memory_space<vmem>>, vector<2x64xf32>
    tpu.vector_store %arg18[%c0_77, %c0_78], %81 {strides = array<i32>} : memref<2x256xf32, #tpu.memory_space<vmem>>, vector<2x64xf32>,
    %c1_79 = arith.constant 1 : index
    %c0_80 = arith.constant 0 : index
    %c0_81 = arith.constant 0 : index
    %83 = vector.load %arg9[%c1_79, %c0_80, %c0_81] : memref<4x2x4xf32, #tpu.memory_space<vmem>>, vector<1x2x4xf32>
    %84 = vector.shape_cast %83 : vector<1x2x4xf32> to vector<2x4xf32>
    %cst_82 = arith.constant dense<0.000000e+00> : vector<2x64xf32>
    %85 = tpu.matmul %84, %78, %cst_82 {dimension_numbers = #tpu.dot_dimension_numbers<[1], [0], [0], [1], [0, 0, 1, 1], [], []>} : vector<2x4xf32>, vector<4x64xf32>, vector<2x64xf32> -> vector<2x64xf32>
    %c0_83 = arith.constant 0 : index
    %c64_84 = arith.constant 64 : index
    %86 = vector.load %arg18[%c0_83, %c64_84] : memref<2x256xf32, #tpu.memory_space<vmem>>, vector<2x64xf32>
    tpu.vector_store %arg18[%c0_83, %c64_84], %85 {strides = array<i32>} : memref<2x256xf32, #tpu.memory_space<vmem>>, vector<2x64xf32>,
    %c2_85 = arith.constant 2 : index
    %c0_86 = arith.constant 0 : index
    %c0_87 = arith.constant 0 : index
    %87 = vector.load %arg9[%c2_85, %c0_86, %c0_87] : memref<4x2x4xf32, #tpu.memory_space<vmem>>, vector<1x2x4xf32>
    %88 = vector.shape_cast %87 : vector<1x2x4xf32> to vector<2x4xf32>
    %cst_88 = arith.constant dense<0.000000e+00> : vector<2x64xf32>
    %89 = tpu.matmul %88, %78, %cst_88 {dimension_numbers = #tpu.dot_dimension_numbers<[1], [0], [0], [1], [0, 0, 1, 1], [], []>} : vector<2x4xf32>, vector<4x64xf32>, vector<2x64xf32> -> vector<2x64xf32>
    %c0_89 = arith.constant 0 : index
    %c128_90 = arith.constant 128 : index
    %90 = vector.load %arg18[%c0_89, %c128_90] : memref<2x256xf32, #tpu.memory_space<vmem>>, vector<2x64xf32>
    tpu.vector_store %arg18[%c0_89, %c128_90], %89 {strides = array<i32>} : memref<2x256xf32, #tpu.memory_space<vmem>>, vector<2x64xf32>,
    %c3_91 = arith.constant 3 : index
    %c0_92 = arith.constant 0 : index
    %c0_93 = arith.constant 0 : index
    %91 = vector.load %arg9[%c3_91, %c0_92, %c0_93] : memref<4x2x4xf32, #tpu.memory_space<vmem>>, vector<1x2x4xf32>
    %92 = vector.shape_cast %91 : vector<1x2x4xf32> to vector<2x4xf32>
    %cst_94 = arith.constant dense<0.000000e+00> : vector<2x64xf32>
    %93 = tpu.matmul %92, %78, %cst_94 {dimension_numbers = #tpu.dot_dimension_numbers<[1], [0], [0], [1], [0, 0, 1, 1], [], []>} : vector<2x4xf32>, vector<4x64xf32>, vector<2x64xf32> -> vector<2x64xf32>
    %c0_95 = arith.constant 0 : index
    %c192_96 = arith.constant 192 : index
    %94 = vector.load %arg18[%c0_95, %c192_96] : memref<2x256xf32, #tpu.memory_space<vmem>>, vector<2x64xf32>
    tpu.vector_store %arg18[%c0_95, %c192_96], %93 {strides = array<i32>} : memref<2x256xf32, #tpu.memory_space<vmem>>, vector<2x64xf32>,
    %c0_97 = arith.constant 0 : index
    %c0_98 = arith.constant 0 : index
    %95 = vector.load %arg18[%c0_97, %c0_98] : memref<2x256xf32, #tpu.memory_space<vmem>>, vector<2x256xf32>
    %c0_99 = arith.constant 0 : index
    %c0_100 = arith.constant 0 : index
    %96 = vector.load %arg10[%c0_99, %c0_100] : memref<256x64xf32, #tpu.memory_space<vmem>>, vector<256x64xf32>
    %cst_101 = arith.constant dense<0.000000e+00> : vector<2x64xf32>
    %97 = tpu.matmul %95, %96, %cst_101 {dimension_numbers = #tpu.dot_dimension_numbers<[1], [0], [0], [1], [0, 0, 1, 1], [], []>} : vector<2x256xf32>, vector<256x64xf32>, vector<2x64xf32> -> vector<2x64xf32>
    %cst_102 = arith.constant dense<0.000000e+00> : vector<64xf32>
    %98 = vector.multi_reduction <add>, %97, %cst_102 [0] : vector<2x64xf32> to vector<64xf32>
    %99 = vector.shape_cast %98 : vector<64xf32> to vector<1x64xf32>
    %100 = arith.mulf %97, %97 : vector<2x64xf32>
    %cst_103 = arith.constant dense<0.000000e+00> : vector<64xf32>
    %101 = vector.multi_reduction <add>, %100, %cst_103 [0] : vector<2x64xf32> to vector<64xf32>
    %102 = vector.shape_cast %101 : vector<64xf32> to vector<1x64xf32>
    %c0_104 = arith.constant 0 : index
    %c0_105 = arith.constant 0 : index
    %103 = vector.load %arg11[%c0_104, %c0_105] : memref<64x32xf32, #tpu.memory_space<vmem>>, vector<64x32xf32>
    %cst_106 = arith.constant dense<0.000000e+00> : vector<1x32xf32>
    %104 = tpu.matmul %99, %103, %cst_106 {dimension_numbers = #tpu.dot_dimension_numbers<[1], [0], [0], [1], [0, 0, 1, 1], [], []>} : vector<1x64xf32>, vector<64x32xf32>, vector<1x32xf32> -> vector<1x32xf32>
    %cst_107 = arith.constant 2.500000e-01 : f32
    %105 = vector.broadcast %cst_107 : f32 to vector<1x32xf32>
    %106 = arith.mulf %104, %105 : vector<1x32xf32>
    %c0_108 = arith.constant 0 : index
    %c0_109 = arith.constant 0 : index
    %107 = vector.load %arg11[%c0_108, %c0_109] : memref<64x32xf32, #tpu.memory_space<vmem>>, vector<64x32xf32>
    %cst_110 = arith.constant dense<0.000000e+00> : vector<1x32xf32>
    %108 = tpu.matmul %102, %107, %cst_110 {dimension_numbers = #tpu.dot_dimension_numbers<[1], [0], [0], [1], [0, 0, 1, 1], [], []>} : vector<1x64xf32>, vector<64x32xf32>, vector<1x32xf32> -> vector<1x32xf32>
    %cst_111 = arith.constant 2.500000e-01 : f32
    %109 = vector.broadcast %cst_111 : f32 to vector<1x32xf32>
    %110 = arith.mulf %108, %109 : vector<1x32xf32>
    %111 = arith.mulf %106, %106 : vector<1x32xf32>
    %112 = arith.subf %110, %111 : vector<1x32xf32>
    %cst_112 = arith.constant 9.99999974E-6 : f32
    %113 = vector.broadcast %cst_112 : f32 to vector<1x32xf32>
    %114 = arith.addf %112, %113 : vector<1x32xf32>
    %115 = math.rsqrt %114 : vector<1x32xf32>
    %c0_113 = arith.constant 0 : index
    %c0_114 = arith.constant 0 : index
    %116 = vector.load %arg12[%c0_113, %c0_114] : memref<32x64xf32, #tpu.memory_space<vmem>>, vector<32x64xf32>
    %cst_115 = arith.constant dense<0.000000e+00> : vector<1x64xf32>
    %117 = tpu.matmul %106, %116, %cst_115 {dimension_numbers = #tpu.dot_dimension_numbers<[1], [0], [0], [1], [0, 0, 1, 1], [], []>} : vector<1x32xf32>, vector<32x64xf32>, vector<1x64xf32> -> vector<1x64xf32>
    %c0_116 = arith.constant 0 : index
    %c0_117 = arith.constant 0 : index
    %118 = vector.load %arg12[%c0_116, %c0_117] : memref<32x64xf32, #tpu.memory_space<vmem>>, vector<32x64xf32>
    %cst_118 = arith.constant dense<0.000000e+00> : vector<1x64xf32>
    %119 = tpu.matmul %115, %118, %cst_118 {dimension_numbers = #tpu.dot_dimension_numbers<[1], [0], [0], [1], [0, 0, 1, 1], [], []>} : vector<1x32xf32>, vector<32x64xf32>, vector<1x64xf32> -> vector<1x64xf32>
    %120 = vector.broadcast %117 : vector<1x64xf32> to vector<2x64xf32>
    %121 = arith.subf %97, %120 : vector<2x64xf32>
    %122 = vector.broadcast %119 : vector<1x64xf32> to vector<2x64xf32>
    %123 = arith.mulf %121, %122 : vector<2x64xf32>
    %cst_119 = arith.constant 0.000000e+00 : f32
    %124 = vector.broadcast %cst_119 : f32 to vector<2x64xf32>
    %125 = arith.cmpf ogt, %123, %124 : vector<2x64xf32>
    %cst_120 = arith.constant 2.000000e-01 : f32
    %126 = vector.broadcast %cst_120 : f32 to vector<2x64xf32>
    %127 = arith.mulf %126, %123 : vector<2x64xf32>
    %128 = arith.select %125, %123, %127 : vector<2x64xi1>, vector<2x64xf32>
    %c0_121 = arith.constant 0 : index
    %c0_122 = arith.constant 0 : index
    %c0_123 = arith.constant 0 : index
    %129 = vector.load %arg13[%c0_121, %c0_122, %c0_123] : memref<3x2x2xf32, #tpu.memory_space<vmem>>, vector<1x2x2xf32>
    %130 = vector.shape_cast %129 : vector<1x2x2xf32> to vector<2x2xf32>
    %cst_124 = arith.constant dense<0.000000e+00> : vector<2x64xf32>
    %131 = tpu.matmul %130, %128, %cst_124 {dimension_numbers = #tpu.dot_dimension_numbers<[1], [0], [0], [1], [0, 0, 1, 1], [], []>} : vector<2x2xf32>, vector<2x64xf32>, vector<2x64xf32> -> vector<2x64xf32>
    %c0_125 = arith.constant 0 : index
    %c0_126 = arith.constant 0 : index
    %132 = vector.load %arg19[%c0_125, %c0_126] : memref<2x192xf32, #tpu.memory_space<vmem>>, vector<2x64xf32>
    tpu.vector_store %arg19[%c0_125, %c0_126], %131 {strides = array<i32>} : memref<2x192xf32, #tpu.memory_space<vmem>>, vector<2x64xf32>,
    %c1_127 = arith.constant 1 : index
    %c0_128 = arith.constant 0 : index
    %c0_129 = arith.constant 0 : index
    %133 = vector.load %arg13[%c1_127, %c0_128, %c0_129] : memref<3x2x2xf32, #tpu.memory_space<vmem>>, vector<1x2x2xf32>
    %134 = vector.shape_cast %133 : vector<1x2x2xf32> to vector<2x2xf32>
    %cst_130 = arith.constant dense<0.000000e+00> : vector<2x64xf32>
    %135 = tpu.matmul %134, %128, %cst_130 {dimension_numbers = #tpu.dot_dimension_numbers<[1], [0], [0], [1], [0, 0, 1, 1], [], []>} : vector<2x2xf32>, vector<2x64xf32>, vector<2x64xf32> -> vector<2x64xf32>
    %c0_131 = arith.constant 0 : index
    %c64_132 = arith.constant 64 : index
    %136 = vector.load %arg19[%c0_131, %c64_132] : memref<2x192xf32, #tpu.memory_space<vmem>>, vector<2x64xf32>
    tpu.vector_store %arg19[%c0_131, %c64_132], %135 {strides = array<i32>} : memref<2x192xf32, #tpu.memory_space<vmem>>, vector<2x64xf32>,
    %c2_133 = arith.constant 2 : index
    %c0_134 = arith.constant 0 : index
    %c0_135 = arith.constant 0 : index
    %137 = vector.load %arg13[%c2_133, %c0_134, %c0_135] : memref<3x2x2xf32, #tpu.memory_space<vmem>>, vector<1x2x2xf32>
    %138 = vector.shape_cast %137 : vector<1x2x2xf32> to vector<2x2xf32>
    %cst_136 = arith.constant dense<0.000000e+00> : vector<2x64xf32>
    %139 = tpu.matmul %138, %128, %cst_136 {dimension_numbers = #tpu.dot_dimension_numbers<[1], [0], [0], [1], [0, 0, 1, 1], [], []>} : vector<2x2xf32>, vector<2x64xf32>, vector<2x64xf32> -> vector<2x64xf32>
    %c0_137 = arith.constant 0 : index
    %c128_138 = arith.constant 128 : index
    %140 = vector.load %arg19[%c0_137, %c128_138] : memref<2x192xf32, #tpu.memory_space<vmem>>, vector<2x64xf32>
    tpu.vector_store %arg19[%c0_137, %c128_138], %139 {strides = array<i32>} : memref<2x192xf32, #tpu.memory_space<vmem>>, vector<2x64xf32>,
    %c0_139 = arith.constant 0 : index
    %c0_140 = arith.constant 0 : index
    %141 = vector.load %arg19[%c0_139, %c0_140] : memref<2x192xf32, #tpu.memory_space<vmem>>, vector<2x192xf32>
    %c0_141 = arith.constant 0 : index
    %c0_142 = arith.constant 0 : index
    %142 = vector.load %arg14[%c0_141, %c0_142] : memref<192x2xf32, #tpu.memory_space<vmem>>, vector<192x2xf32>
    %cst_143 = arith.constant dense<0.000000e+00> : vector<2x2xf32>
    %143 = tpu.matmul %141, %142, %cst_143 {dimension_numbers = #tpu.dot_dimension_numbers<[1], [0], [0], [1], [0, 0, 1, 1], [], []>} : vector<2x192xf32>, vector<192x2xf32>, vector<2x2xf32> -> vector<2x2xf32>
    %c0_144 = arith.constant 0 : index
    %c0_145 = arith.constant 0 : index
    %c0_146 = arith.constant 0 : index
    %144 = vector.load %arg15[%c0_144, %c0_145, %c0_146] : memref<1x2x2xf32, #tpu.memory_space<vmem>>, vector<1x2x2xf32>
    %145 = vector.shape_cast %144 : vector<1x2x2xf32> to vector<2x2xf32>
    %146 = vector.shape_cast %143 : vector<2x2xf32> to vector<1x2x2xf32>
    tpu.vector_store %arg15[%c0_144, %c0_145, %c0_146], %146 {strides = array<i32>} : memref<1x2x2xf32, #tpu.memory_space<vmem>>, vector<1x2x2xf32>,
    return
  }
  func.func @transform_0(%arg0: i32) -> (i32, i32, i32) {
    %c0_i32 = arith.constant 0 : i32
    %c0_i32_0 = arith.constant 0 : i32
    %c0_i32_1 = arith.constant 0 : i32
    return %arg0, %c0_i32, %c0_i32_0 : i32, i32, i32
  }
  func.func @transform_1(%arg0: i32) -> (i32, i32, i32) {
    %c0_i32 = arith.constant 0 : i32
    %c0_i32_0 = arith.constant 0 : i32
    %c0_i32_1 = arith.constant 0 : i32
    %c0_i32_2 = arith.constant 0 : i32
    return %c0_i32, %c0_i32_0, %c0_i32_1 : i32, i32, i32
  }
  func.func @transform_2(%arg0: i32) -> (i32, i32) {
    %c0_i32 = arith.constant 0 : i32
    %c0_i32_0 = arith.constant 0 : i32
    %c0_i32_1 = arith.constant 0 : i32
    return %c0_i32, %c0_i32_0 : i32, i32
  }
  func.func @transform_3(%arg0: i32) -> (i32, i32) {
    %c0_i32 = arith.constant 0 : i32
    %c0_i32_0 = arith.constant 0 : i32
    %c0_i32_1 = arith.constant 0 : i32
    return %c0_i32, %c0_i32_0 : i32, i32
  }
  func.func @transform_4(%arg0: i32) -> (i32, i32, i32) {
    %c0_i32 = arith.constant 0 : i32
    %c0_i32_0 = arith.constant 0 : i32
    %c0_i32_1 = arith.constant 0 : i32
    %c0_i32_2 = arith.constant 0 : i32
    return %c0_i32, %c0_i32_0, %c0_i32_1 : i32, i32, i32
  }
  func.func @transform_5(%arg0: i32) -> (i32, i32) {
    %c0_i32 = arith.constant 0 : i32
    %c0_i32_0 = arith.constant 0 : i32
    %c0_i32_1 = arith.constant 0 : i32
    return %c0_i32, %c0_i32_0 : i32, i32
  }
  func.func @transform_6(%arg0: i32) -> (i32, i32) {
    %c0_i32 = arith.constant 0 : i32
    %c0_i32_0 = arith.constant 0 : i32
    %c0_i32_1 = arith.constant 0 : i32
    return %c0_i32, %c0_i32_0 : i32, i32
  }
  func.func @transform_7(%arg0: i32) -> (i32, i32) {
    %c0_i32 = arith.constant 0 : i32
    %c0_i32_0 = arith.constant 0 : i32
    %c0_i32_1 = arith.constant 0 : i32
    return %c0_i32, %c0_i32_0 : i32, i32
  }
  func.func @transform_8(%arg0: i32) -> (i32, i32, i32) {
    %c0_i32 = arith.constant 0 : i32
    %c0_i32_0 = arith.constant 0 : i32
    %c0_i32_1 = arith.constant 0 : i32
    %c0_i32_2 = arith.constant 0 : i32
    return %c0_i32, %c0_i32_0, %c0_i32_1 : i32, i32, i32
  }
  func.func @transform_9(%arg0: i32) -> (i32, i32) {
    %c0_i32 = arith.constant 0 : i32
    %c0_i32_0 = arith.constant 0 : i32
    %c0_i32_1 = arith.constant 0 : i32
    return %c0_i32, %c0_i32_0 : i32, i32
  }
  func.func @transform_10(%arg0: i32) -> (i32, i32) {
    %c0_i32 = arith.constant 0 : i32
    %c0_i32_0 = arith.constant 0 : i32
    %c0_i32_1 = arith.constant 0 : i32
    return %c0_i32, %c0_i32_0 : i32, i32
  }
  func.func @transform_11(%arg0: i32) -> (i32, i32) {
    %c0_i32 = arith.constant 0 : i32
    %c0_i32_0 = arith.constant 0 : i32
    %c0_i32_1 = arith.constant 0 : i32
    return %c0_i32, %c0_i32_0 : i32, i32
  }
  func.func @transform_12(%arg0: i32) -> (i32, i32, i32) {
    %c0_i32 = arith.constant 0 : i32
    %c0_i32_0 = arith.constant 0 : i32
    %c0_i32_1 = arith.constant 0 : i32
    %c0_i32_2 = arith.constant 0 : i32
    return %c0_i32, %c0_i32_0, %c0_i32_1 : i32, i32, i32
  }
  func.func @transform_13(%arg0: i32) -> (i32, i32) {
    %c0_i32 = arith.constant 0 : i32
    %c0_i32_0 = arith.constant 0 : i32
    %c0_i32_1 = arith.constant 0 : i32
    return %c0_i32, %c0_i32_0 : i32, i32
  }
  func.func @transform_14(%arg0: i32) -> (i32, i32, i32) {
    %c0_i32 = arith.constant 0 : i32
    %c0_i32_0 = arith.constant 0 : i32
    %c0_i32_1 = arith.constant 0 : i32
    return %arg0, %c0_i32, %c0_i32_0 : i32, i32, i32
  }
}

</mosaic_0001>

<bundles_post_ra>
// kernel: tile.8
= control target key start
LH: loop header
LB: loop body
LE: loop exit
PB: predicated region body
PF: predicated region fallthrough
CT: control target
= control target key end

     0   :  { %s22_s0 = inlined_call_operand.vmem [shape: f32[8], index: 0, kind: input, shape index: {}]   ;;  %s23_s1 = inlined_call_operand.vmem [shape: f32[8,8], index: 1, kind: output, shape index: {}]  }
   0x1   :  { %v4_v0 = vld [vmem:[%s22_s0] ss:$0 sm:$0xff] }
   0x2   :  { %5 = vst [vmem:[%s23_s1] sm:$0xff] %v4_v0 }

// kernel: tile.9
= control target key start
LH: loop header
LB: loop body
LE: loop exit
PB: predicated region body
PF: predicated region fallthrough
CT: control target
= control target key end

     0   :  { %s67_s10 = smov 56   ;;  %s68_s11 = smov 40   ;;  %vm3_vm0 = vcmask 64512   ;;  %vm9_vm1 = vcmask 523712   ;;  %vm15_vm2 = vcmask 458112   ;;  %vm21_vm3 = vcmask 392512   ;;  %s111_s0 = inlined_call_operand.vmem [shape: f32[8,8], index: 0, kind: input, shape index: {}]   ;;  %s112_s1 = inlined_call_operand.vmem [shape: f32[1,64], index: 1, kind: output, shape index: {}]  }
   0x1   :  { %v53_v0 = vld [vmem:[%s111_s0 + $0x7] sm:$0x1]   ;;  %v55_v1 = vld [vmem:[%s111_s0 + $0x5] sm:$0x1]   ;;  %v57_v2 = vld [vmem:[%s111_s0 + $0x3] sm:$0x1]  }
   0x2   :  { %7 = vrot.lane.b32.xlu0 %v53_v0, %s67_s10  ;;  %19 = vrot.lane.b32.xlu1 %v55_v1, %s68_s11  ;;  %s69_s14 = smov 24   ;;  %v54_v3 = vld [vmem:[%s111_s0 + $0x6] sm:$0x1]   ;;  %v56_v4 = vld [vmem:[%s111_s0 + $0x4] sm:$0x1]   ;;  %s70_s21 = smov 48  }
   0x3   :  { %31 = vrot.lane.b32.xlu2 %v57_v2, %s69_s14  ;;  %v58_v5 = vld [vmem:[%s111_s0 + $0x2] sm:$0x1]   ;;  %s71_s22 = smov 32   ;;  %s72_s23 = smov 16   ;;  %v59_v6 = vld [vmem:[%s111_s0 + $0x1] sm:$0x1]  }
   0x4   :  { %s73_s26 = smov 8   ;;  %v2_v7 = vld [vmem:[%s111_s0] sm:$0x1]   ;;  %vm27_vm4 = vcmask 326912   ;;  %vm33_vm5 = vcmask 261312   ;;  %vm39_vm6 = vcmask 195712  }
   0x5   :  { %4 = vst.msk [vmem:[#allocation0] sm:$0x1] %vm3_vm0, %v2_v7   ;;  %vm45_vm7 = vcmask 130112  }
   0xa   :  { %13 = vrot.lane.b32.xlu0 %v54_v3, %s70_s21  ;;  %25 = vrot.lane.b32.xlu1 %v56_v4, %s71_s22 }
   0xb   :  { %37 = vrot.lane.b32.xlu2 %v58_v5, %s72_s23 }
  0x12   :  { %43 = vrot.lane.b32.xlu0 %v59_v6, %s73_s26 }
  0x5d   :  { %v32_v8 = vpop.permute.xlu2 %31  }
  0x65   :  { %v38_v9 = vpop.permute.xlu2 %37  }
  0x74   :  { %v8_v10 = vpop.permute.xlu0 %7   ;;  %v20_v11 = vpop.permute.xlu1 %19  }
  0x75   :  { %10 = vst.msk [vmem:[#allocation0] sm:$0x1] %vm9_vm1, %v8_v10  }
  0x7c   :  { %v14_v12 = vpop.permute.xlu0 %13   ;;  %v26_v13 = vpop.permute.xlu1 %25  }
  0x7d   :  { %16 = vst.msk [vmem:[#allocation0] sm:$0x1] %vm15_vm2, %v14_v12  }
  0x7e   :  { %22 = vst.msk [vmem:[#allocation0] sm:$0x1] %vm21_vm3, %v20_v11  }
  0x7f   :  { %28 = vst.msk [vmem:[#allocation0] sm:$0x1] %vm27_vm4, %v26_v13  }
  0x80   :  { %34 = vst.msk [vmem:[#allocation0] sm:$0x1] %vm33_vm5, %v32_v8  }
  0x81   :  { %40 = vst.msk [vmem:[#allocation0] sm:$0x1] %vm39_vm6, %v38_v9  }
  0x84   :  { %v44_v14 = vpop.permute.xlu0 %43  }
  0x85   :  { %46 = vst.msk [vmem:[#allocation0] sm:$0x1] %vm45_vm7, %v44_v14  }
  0x8c   :  { %v49_v15 = vld [vmem:[#allocation0] sm:$0x1] }
  0x8d   :  { %52 = vst [vmem:[%s112_s1] sm:$0x1] %v49_v15 }

// kernel: discriminator_forward.1
= control target key start
LH: loop header
LB: loop body
LE: loop exit
PB: predicated region body
PF: predicated region fallthrough
CT: control target
= control target key end

     0   :  { %s2386_s0 = inlined_call_operand.vmem [shape: f32[2,16,48], index: 0, kind: input, shape index: {}]   ;;  %s2387_s1 = inlined_call_operand.vmem [shape: f32[4,8,16], index: 1, kind: input, shape index: {}]   ;;  %s2388_s2 = inlined_call_operand.vmem [shape: f32[192,64], index: 2, kind: input, shape index: {}]   ;;  %s2389_s3 = inlined_call_operand.vmem [shape: f32[1,64], index: 3, kind: input, shape index: {}]   ;;  %s2390_s4 = inlined_call_operand.vmem [shape: f32[4,4,8], index: 4, kind: input, shape index: {}]   ;;  %s2391_s5 = inlined_call_operand.vmem [shape: f32[256,64], index: 5, kind: input, shape index: {}]   ;;  %s2392_s6 = inlined_call_operand.vmem [shape: f32[64,16], index: 6, kind: input, shape index: {}]   ;;  %s2393_s7 = inlined_call_operand.vmem [shape: f32[16,64], index: 7, kind: input, shape index: {}]   ;;  %s2394_s8 = inlined_call_operand.vmem [shape: f32[4,2,4], index: 8, kind: input, shape index: {}]   ;;  %s2395_s9 = inlined_call_operand.vmem [shape: f32[256,64], index: 9, kind: input, shape index: {}]   ;;  %s2396_s10 = inlined_call_operand.vmem [shape: f32[64,32], index: 10, kind: input, shape index: {}]   ;;  %s2397_s11 = inlined_call_operand.vmem [shape: f32[32,64], index: 11, kind: input, shape index: {}]   ;;  %s2398_s12 = inlined_call_operand.vmem [shape: f32[3,2,2], index: 12, kind: input, shape index: {}]   ;;  %s2399_s13 = inlined_call_operand.vmem [shape: f32[192,2], index: 13, kind: input, shape index: {}]   ;;  %s2400_s14 = inlined_call_operand.hbm [shape: f32[2,2,2], index: 14, kind: output, shape index: {}]  }
   0x1   :  { %2404 = sst [smem:[#allocation11_spill]] %s2386_s0 }
   0x2   :  { %2405 = sst [smem:[#allocation12_spill]] %s2387_s1 }
   0x3   :  { %2406 = sst [smem:[#allocation13_spill]] %s2388_s2 }
   0x4   :  { %19 = vsyncpa [#allocation7], 0 }
   0x5   :  { %21 = vsyncpa [#allocation7 + $0x1], 0  ;;  %s1818_s29 = smov 0   ;;  %s1820_s30 = smov 0  }
   0x6   :  { %s1822_s15 = smov 0   ;;  %s1824_s16 = smov 0  }
   0x7 LB: > { %2407 = sst [smem:[#allocation9_spill]] %s1733_s15  ;;  %s1839_s17 = sadd.s32 4294967295, %s1737_s16   ;;  %s1737_s16 = sphi %s1824_s16, %s2419_s16   ;;  %s1733_s15 = sphi %s1822_s15, %s2416_s15   ;;  %s1729_s30 = sphi %s1820_s30, %s2418_s30   ;;  %s1725_s29 = sphi %s1818_s29, %s2417_s29  }
   0x8   : > { %s1572_s18 = sadd.s32 4294967294, %s1737_s16   ;;  %s1843_s19 = sadd.s32 1, %s1737_s16  }
   0x9   : > { %s333_s20 = sadd.s32 1, %s1733_s15  ;;  %s330_s21 = ssub.s32 %s1737_s16, %s1843_s19 }
   0xa   : > { %p343_p0 = scmp.ne.s32.totalorder %s1733_s15, %s1729_s30  ;;  %p331_p1 = scmp.eq.s32.totalorder %s330_s21, 0 }
   0xb   : > { %p344_p2 = scmp.eq.s32.totalorder %s1839_s17, 1  ;;  %p349_p3 = scmp.ne.s32.totalorder %s1729_s30, %s1725_s29 }
   0xc   : > { %p350_p4 = scmp.eq.s32.totalorder %s1572_s18, 1  ;;  %p1575_p7 = scmp.ge.s32.totalorder %s1737_s16, 1 }
   0xd   : > { %s1854_s22 = scalar_select %p331_p1, %s1733_s15, %s333_s20  }
   0xe   : > { %p1856_p5 = por %p344_p2, %p343_p0  ;;  %p1860_p6 = por %p350_p4, %p349_p3 }
   0xf   : > { %2408 = sst [smem:[#allocation10_spill]] %s1854_s22  ;;  %p415_p8 = scmp.lt.s32.totalorder %s1737_s16, 3 }
  0x11   : > { %p416_p9 = pnand %p1575_p7, %p415_p8 }
  0x12   : > { %p461_p10 = scmp.lt.s32.totalorder (!%p416_p9), %s1839_s17, 1  ;;  %s2411_s0 = sld [smem:[#allocation11_spill]] (!%p416_p9) }
  0x13   : > { %419 = sbr.rel (%p416_p9) target bundleno = 2244 (0x8c4), region = 76  ;;  %s2412_s1 = sld [smem:[#allocation12_spill]] (!%p416_p9) }
  0x14   : > { %s2413_s2 = sld [smem:[#allocation13_spill]] (!%p416_p9)  ;;  %s1739_s15 = smov (!%p416_p9), 48  }
  0x15   : > { %s1740_s20 = smov (!%p416_p9), 96   ;;  %s1741_s21 = smov (!%p416_p9), 16  }
  0x16   : > { %s2402_s22 = smov (!%p416_p9), 64  }
  0x18   : > { %s462_s25 = scalar_select %p461_p10, %s1839_s17, 1  ;;  %vm469_vm0 = vcmask 130048   ;;  %vm493_vm1 = vcmask 392192   ;;  %vm524_vm2 = vcmask 785792   ;;  %vm555_vm3 = vcmask 1048320   ;;  %v796_v50 = vld [vmem:[%s2391_s5 + $0x78] sm:$0xff] }
  0x19   : > { %v1582_v2 = vld [vmem:[%s2412_s1 + $0x10] sm:$0xff]  ;;  %v1580_v3 = vld [vmem:[%s2412_s1 + $0x8] sm:$0xff]  ;;  %v1584_v4 = vld [vmem:[%s2412_s1 + $0x18] sm:$0xff]  ;;  %vm587_vm4 = vcmask 523392   ;;  %vm619_vm5 = vcmask 523264   ;;  %vm667_vm7 = vcmask 64512  }
  0x1a   : > { %s1626_s26 = sshll.u32 %s462_s25, 4  ;;  %v468_v5 = vld [vmem:[%s2412_s1] sm:$0xff]  ;;  %v606_v6 = vld [vmem:[%s2413_s2 + $0x78] sm:$0xff]  ;;  %v605_v7 = vld [vmem:[%s2413_s2 + $0x70] sm:$0xff]  ;;  %vm691_vm8 = vcmask 519168   ;;  %vm722_vm9 = vcmask 1043968  }
  0x1b   : > { %s465_s18 = scalar_lea.vmem %s2411_s0, %s1626_s26  ;;  %v604_v8 = vld [vmem:[%s2413_s2 + $0x68] sm:$0xff]  ;;  %v603_v9 = vld [vmem:[%s2413_s2 + $0x60] sm:$0xff]  ;;  %v602_v10 = vld [vmem:[%s2413_s2 + $0x58] sm:$0xff]  ;;  %vm1003_vm14 = vcmask 1043456   ;;  %vm999_vm15 = vcmask 31744   ;;  %s458_s25 = sand.u32 1, %s1729_s30  }
  0x1c   : > { %v467_v0 = vld [vmem:[%s465_s18 + $0x8] sm:$0xff]  ;;  %v466_v1 = vld [vmem:[%s465_s18] sm:$0xff]  ;;  %v601_v11 = vld [vmem:[%s2413_s2 + $0x50] sm:$0xff]  ;;  %s2414_s18 = smov 64   ;;  %s1576_s27 = sshll.u32 %s458_s25, 1 }
  0x1d   : > { %545 = vmatpush.msra.mxu2 %v467_v0  ;;  %514 = vmatpush.msra.mxu1 %v467_v0  ;;  %v600_v12 = vld [vmem:[%s2413_s2 + $0x48] sm:$0xff]  ;;  %v599_v13 = vld [vmem:[%s2413_s2 + $0x40] sm:$0xff]  ;;  %v598_v14 = vld [vmem:[%s2413_s2 + $0x38] sm:$0xff]  ;;  %s1623_s26 = sshll.u32 %s1839_s17, 1 }
  0x1e   : > { %577 = vmatpush.msra.mxu3 %v467_v0  ;;  %487 = vmatpush.msra.mxu0 %v467_v0  ;;  %v597_v15 = vld [vmem:[%s2413_s2 + $0x30] sm:$0xff]  ;;  %v596_v17 = vld [vmem:[%s2413_s2 + $0x28] sm:$0xff]  ;;  %v595_v21 = vld [vmem:[%s2413_s2 + $0x20] sm:$0xff]  ;;  %s1508_s1 = scalar_lea.hbm %s2400_s14, %s1623_s26 }
  0x1f   : > { %546 = vmatpush.msra.mxu2 %v466_v1  ;;  %515 = vmatpush.msra.mxu1 %v466_v1  ;;  %v594_v22 = vld [vmem:[%s2413_s2 + $0x18] sm:$0xff]  ;;  %v593_v24 = vld [vmem:[%s2413_s2 + $0x10] sm:$0xff]  ;;  %v592_v26 = vld [vmem:[%s2413_s2 + $0x8] sm:$0xff] }
  0x20   : > { %1583 = vmatmul.msk.f32.vlgmr.msra.gmra.mxu2 %vm469_vm0, %v1582_v2  ;;  %1581 = vmatmul.msk.f32.vlgmr.msra.gmra.mxu1 %vm469_vm0, %v1580_v3  ;;  %v614_v23 = vld [vmem:[%s2413_s2 + $0xb8] sm:$0xff]  ;;  %v613_v25 = vld [vmem:[%s2413_s2 + $0xb0] sm:$0xff]  ;;  %v612_v27 = vld [vmem:[%s2413_s2 + $0xa8] sm:$0xff] }
  0x21   : > { %578 = vmatpush.msra.mxu3 %v466_v1  ;;  %488 = vmatpush.msra.mxu0 %v466_v1  ;;  %v611_v28 = vld [vmem:[%s2413_s2 + $0xa0] sm:$0xff]  ;;  %v610_v30 = vld [vmem:[%s2413_s2 + $0x98] sm:$0xff]  ;;  %v609_v31 = vld [vmem:[%s2413_s2 + $0x90] sm:$0xff] }
  0x22   : > { %1585 = vmatmul.msk.f32.vlgmr.msra.gmra.mxu3 %vm469_vm0, %v1584_v4  ;;  %1579 = vmatmul.msk.f32.vlgmr.msra.gmra.mxu0 %vm469_vm0, %v468_v5  ;;  %v591_v29 = vld [vmem:[%s2413_s2] sm:$0xff]  ;;  %v608_v32 = vld [vmem:[%s2413_s2 + $0x88] sm:$0xff]  ;;  %v812_v51 = vld [vmem:[%s2391_s5 + $0xf8] sm:$0xff] }
  0x23   : > { %623 = vmatpush.msrb.mxu0 %v606_v6  ;;  %651 = vmatpush.msrb.mxu3 %v614_v23  ;;  %v607_v33 = vld [vmem:[%s2413_s2 + $0x80] sm:$0xff]  ;;  %v1592_v48 = vld [vmem:[%s2390_s4 + $0xc] sm:$0xf]  ;;  %v1590_v49 = vld [vmem:[%s2390_s4 + $0x8] sm:$0xf] }
  0x24   : > { %v1670_v39 = vld [vmem:[%s2389_s3] ss:$0 sm:$0xff]  ;;  %v1588_v45 = vld [vmem:[%s2390_s4 + $0x4] sm:$0xf]  ;;  %v795_v52 = vld [vmem:[%s2391_s5 + $0x70] sm:$0xff]  ;;  %819 = vmatpush.msrb.mxu1 %v796_v50 }
  0x25   : > { %624 = vmatpush.msrb.mxu0 %v605_v7  ;;  %652 = vmatpush.msrb.mxu3 %v613_v25  ;;  %v666_v47 = vld [vmem:[%s2390_s4] sm:$0xf]  ;;  %v811_v53 = vld [vmem:[%s2391_s5 + $0xf0] sm:$0xff]  ;;  %v794_v54 = vld [vmem:[%s2391_s5 + $0x68] sm:$0xff] }
  0x26   : > { %v810_v55 = vld [vmem:[%s2391_s5 + $0xe8] sm:$0xff]  ;;  %820 = vmatpush.msrb.mxu1 %v795_v52  ;;  %v793_v56 = vld [vmem:[%s2391_s5 + $0x60] sm:$0xff]  ;;  %v792_v58 = vld [vmem:[%s2391_s5 + $0x58] sm:$0xff] }
  0x27   : > { %625 = vmatpush.msrb.mxu0 %v604_v8  ;;  %653 = vmatpush.msrb.mxu3 %v612_v27  ;;  %v809_v57 = vld [vmem:[%s2391_s5 + $0xe0] sm:$0xff]  ;;  %v808_v59 = vld [vmem:[%s2391_s5 + $0xd8] sm:$0xff]  ;;  %v791_v60 = vld [vmem:[%s2391_s5 + $0x50] sm:$0xff] }
  0x28   : > { %821 = vmatpush.msrb.mxu1 %v794_v54  ;;  %v807_v61 = vld [vmem:[%s2391_s5 + $0xd0] sm:$0xff]  ;;  %v790_v62 = vld [vmem:[%s2391_s5 + $0x48] sm:$0xff]  ;;  %v789_v0 = vld [vmem:[%s2391_s5 + $0x40] sm:$0xff] }
  0x29   : > { %626 = vmatpush.msrb.mxu0 %v603_v9  ;;  %654 = vmatpush.msrb.mxu3 %v611_v28  ;;  %v806_v63 = vld [vmem:[%s2391_s5 + $0xc8] sm:$0xff]  ;;  %v805_v5 = vld [vmem:[%s2391_s5 + $0xc0] sm:$0xff]  ;;  %v788_v6 = vld [vmem:[%s2391_s5 + $0x38] sm:$0xff] }
  0x2a   : > { %822 = vmatpush.msrb.mxu1 %v793_v56  ;;  %v804_v7 = vld [vmem:[%s2391_s5 + $0xb8] sm:$0xff]  ;;  %v787_v8 = vld [vmem:[%s2391_s5 + $0x30] sm:$0xff]  ;;  %v943_v54 = vld [vmem:[%s2393_s7] sm:$0xff] }
  0x2b   : > { %627 = vmatpush.msrb.mxu0 %v602_v10  ;;  %655 = vmatpush.msrb.mxu3 %v610_v30  ;;  %v803_v9 = vld [vmem:[%s2391_s5 + $0xb0] sm:$0xff]  ;;  %v786_v10 = vld [vmem:[%s2391_s5 + $0x28] sm:$0xff]  ;;  %v881_v27 = vld [vmem:[%s2392_s6 + $0x38] sm:$0xff] }
  0x2c   : > { %823 = vmatpush.msrb.mxu1 %v792_v58  ;;  %v880_v28 = vld [vmem:[%s2392_s6 + $0x30] sm:$0xff]  ;;  %v878_v30 = vld [vmem:[%s2392_s6 + $0x20] sm:$0xff] }
  0x2d   : > { %628 = vmatpush.msrb.mxu0 %v601_v11  ;;  %656 = vmatpush.msrb.mxu3 %v609_v31  ;;  %v802_v11 = vld [vmem:[%s2391_s5 + $0xa8] sm:$0xff]  ;;  %v877_v31 = vld [vmem:[%s2392_s6 + $0x18] sm:$0xff] }
  0x2e   : > { %824 = vmatpush.msrb.mxu1 %v791_v60 }
  0x2f   : > { %629 = vmatpush.msrb.mxu0 %v600_v12  ;;  %657 = vmatpush.msrb.mxu3 %v608_v32  ;;  %v785_v12 = vld [vmem:[%s2391_s5 + $0x20] sm:$0xff]  ;;  %v876_v32 = vld [vmem:[%s2392_s6 + $0x10] sm:$0xff] }
  0x30   : > { %825 = vmatpush.msrb.mxu1 %v790_v62 }
  0x31   : > { %630 = vmatpush.msrb.mxu0 %v599_v13  ;;  %658 = vmatpush.msrb.mxu3 %v607_v33  ;;  %v801_v13 = vld [vmem:[%s2391_s5 + $0xa0] sm:$0xff]  ;;  %v875_v33 = vld [vmem:[%s2392_s6 + $0x8] sm:$0xff] }
  0x32   : > { %826 = vmatpush.msrb.mxu1 %v789_v0 }
  0x33   : > { %631 = vmatpush.msrb.mxu0 %v598_v14  ;;  %v784_v14 = vld [vmem:[%s2391_s5 + $0x18] sm:$0xff] }
  0x34   : > { %827 = vmatpush.msrb.mxu1 %v788_v6 }
  0x35   : > { %632 = vmatpush.msrb.mxu0 %v597_v15  ;;  %v800_v15 = vld [vmem:[%s2391_s5 + $0x98] sm:$0xff] }
  0x36   : > { %828 = vmatpush.msrb.mxu1 %v787_v8 }
  0x37   : > { %633 = vmatpush.msrb.mxu0 %v596_v17  ;;  %v799_v17 = vld [vmem:[%s2391_s5 + $0x90] sm:$0xff] }
  0x38   : > { %829 = vmatpush.msrb.mxu1 %v786_v10 }
  0x39   : > { %634 = vmatpush.msrb.mxu0 %v595_v21  ;;  %v797_v21 = vld [vmem:[%s2391_s5 + $0x80] sm:$0xff] }
  0x3a   : > { %830 = vmatpush.msrb.mxu1 %v785_v12 }
  0x3b   : > { %635 = vmatpush.msrb.mxu0 %v594_v22 }
  0x3c   : > { %831 = vmatpush.msrb.mxu1 %v784_v14  ;;  %v1600_v14 = vld [vmem:[%s2394_s8 + $0x2] sm:$0x3] }
  0x3d   : > { %636 = vmatpush.msrb.mxu0 %v593_v24 }
  0x3f   : > { %637 = vmatpush.msrb.mxu0 %v592_v26 }
  0x41   : > { %638 = vmatpush.msrb.mxu0 %v591_v29  ;;  %v879_v29 = vld [vmem:[%s2392_s6 + $0x28] sm:$0xff] }
  0x43   : > { %917 = vmatpush.msra.mxu0 %v881_v27 }
  0x45   : > { %918 = vmatpush.msra.mxu0 %v880_v28 }
  0x47   : > { %919 = vmatpush.msra.mxu0 %v879_v29 }
  0x49   : > { %920 = vmatpush.msra.mxu0 %v878_v30 }
  0x4b   : > { %921 = vmatpush.msra.mxu0 %v877_v31 }
  0x4d   : > { %922 = vmatpush.msra.mxu0 %v876_v32 }
  0x4f   : > { %923 = vmatpush.msra.mxu0 %v875_v33 }
  0x9d   : > { %v517_v16 = vpop.f32.mrf.mxu1 }
  0x9e   : > { %521 = vrot.lane.b32.xlu1 %v517_v16, %s1739_s15  ;;  %v783_v16 = vld [vmem:[%s2391_s5 + $0x10] sm:$0xff] }
  0x9f   : > { %v490_v18 = vpop.f32.mrf.mxu0  ;;  %832 = vmatpush.msrb.mxu1 %v783_v16  ;;  %v998_v16 = vld [vmem:[%s2394_s8] sm:$0x3] }
  0xa0   : > { %494 = vst.msk [vmem:[#allocation2] sm:$0xff] %vm493_vm1, %v490_v18  ;;  %v782_v18 = vld [vmem:[%s2391_s5 + $0x8] sm:$0xff]  ;;  %vm1058_vm1 = vcmask 1041920  }
  0xa1   : > { %833 = vmatpush.msrb.mxu1 %v782_v18  ;;  %v1148_v18 = vld [vmem:[%s2395_s9 + $0xf8] sm:$0xff] }
  0xa3   : > { %v548_v19 = vpop.f32.mrf.mxu2 }
  0xa4   : > { %552 = vrot.lane.b32.xlu0 %v548_v19, %s1740_s20  ;;  %v798_v19 = vld [vmem:[%s2391_s5 + $0x88] sm:$0xff]  ;;  %s1512_s20 = sshll.u32 %s1508_s1, 4  ;;  %s1513_s20 = int_to_ptr.hbm [resolvable:$true] %s1512_s20 }
  0xa5   : > { %v580_v20 = vpop.f32.mrf.mxu3 }
  0xac   : > { %584 = vrot.lane.b32.xlu0 %v580_v20, %s1741_s21  ;;  %v781_v20 = vld [vmem:[%s2391_s5] sm:$0xff]  ;;  %s1689_s21 = sshra.s32 %s1513_s20, 4  ;;  %s1690_s21 = int_to_ptr.hbm [resolvable:$true] %s1689_s21 }
  0xad   : > { %834 = vmatpush.msrb.mxu1 %v781_v20  ;;  %v1147_v20 = vld [vmem:[%s2395_s9 + $0xf0] sm:$0xff]  ;;  %s1691_s2 = scalar_lea.hbm %s1690_s21, 2  ;;  %p1696_p0 = scmp.lt.s32.totalorder %s1690_s21, %s2400_s14 }
  0xae   : > { %p1692_p11 = scmp.ne.s32.totalorder %s1690_s21, %s1691_s2 }
  0xb0   : > { %p1693_p12 = pnand %p1692_p11, %p1856_p5 }
  0xb2   : > { %p1694_p13 = pneg %p1693_p12 }
 0x110   : > { %v522_v34 = vpop.permute.xlu1 %521 }
 0x111   : > { %525 = vst.msk [vmem:[#allocation2] sm:$0xff] %vm524_vm2, %v522_v34  ;;  %v874_v34 = vld [vmem:[%s2392_s6] sm:$0xff]  ;;  %vm1283_vm2 = vcmask 261120  }
 0x112   : > { %924 = vmatpush.msra.mxu0 %v874_v34 }
 0x116   : > { %v553_v35 = vpop.permute.xlu0 %552 }
 0x117   : > { %556 = vst.msk [vmem:[#allocation2] sm:$0xff] %vm555_vm3, %v553_v35 }
 0x118   : > { %557 = vst.msk [vmem:[#allocation2 + $0x8] sm:$0xff] %vm469_vm0, %v553_v35 }
 0x11e   : > { %v585_v36 = vpop.permute.xlu0 %584  ;;  %v589_v37 = vld [vmem:[#allocation2] sm:$0xff] }
 0x11f   : > { %588 = vst.msk [vmem:[#allocation2 + $0x8] sm:$0xff] %vm587_vm4, %v585_v36  ;;  %639 = vmatmul.f32.vlgmr.msrb.gmra.mxu0 %v589_v37 }
 0x126   : > { %v590_v38 = vld [vmem:[#allocation2 + $0x8] sm:$0xff] }
 0x127   : > { %1586 = vmatmul.msk.f32.vlgmr.msrb.gmra.mxu3 %vm619_vm5, %v590_v38 }
 0x19c   : > { %v640_v40 = vpop.f32.mrf.mxu0 }
 0x19d   : > { %v641_v41 = vadd.f32 %v1670_v39, %v640_v40 }
 0x1aa   : > { %v660_v42 = vpop.f32.mrf.mxu3 }
 0x1ab   : > { %v661_v43 = vadd.f32 %v660_v42, %v641_v41 }
 0x1ad   : > { %vm663_vm6 = vcmp.gt.f32.partialorder %v661_v43, 0.0  ;;  %v664_v44 = vmul.f32 0.2, %v661_v43 }
 0x1af   : > { %v665_v46 = vsel %vm663_vm6, %v661_v43, %v664_v44 }
 0x1b0   : > { %686 = vmatpush.msrb.mxu2 %v665_v46  ;;  %713 = vmatpush.msra.mxu3 %v665_v46 }
 0x1b1   : > { %1589 = vmatmul.msk.f32.vlgmr.msra.gmra.mxu3 %vm667_vm7, %v1588_v45  ;;  %1587 = vmatmul.msk.f32.vlgmr.msrb.gmra.mxu2 %vm667_vm7, %v666_v47 }
 0x1b2   : > { %744 = vmatpush.msra.mxu2 %v665_v46  ;;  %770 = vmatpush.msrb.mxu3 %v665_v46 }
 0x1b4   : > { %839 = vmatpush.msrb.mxu2 %v812_v51  ;;  %893 = vmatpush.msra.mxu3 %v881_v27  ;;  %v1127_v27 = vld [vmem:[%s2395_s9 + $0x50] sm:$0xff] }
 0x1b6   : > { %840 = vmatpush.msrb.mxu2 %v811_v53  ;;  %894 = vmatpush.msra.mxu3 %v880_v28  ;;  %v944_v53 = vld [vmem:[%s2393_s7 + $0x8] sm:$0xff]  ;;  %v1143_v28 = vld [vmem:[%s2395_s9 + $0xd0] sm:$0xff] }
 0x1b8   : > { %841 = vmatpush.msrb.mxu2 %v810_v55  ;;  %895 = vmatpush.msra.mxu3 %v879_v29  ;;  %v1126_v29 = vld [vmem:[%s2395_s9 + $0x48] sm:$0xff] }
 0x1b9   : > { %1593 = vmatmul.msk.f32.vlgmr.msrb.gmra.mxu3 %vm667_vm7, %v1592_v48  ;;  %1591 = vmatmul.msk.f32.vlgmr.msra.gmra.mxu2 %vm667_vm7, %v1590_v49 }
 0x1ba   : > { %842 = vmatpush.msrb.mxu2 %v809_v57  ;;  %896 = vmatpush.msra.mxu3 %v878_v30  ;;  %v1142_v30 = vld [vmem:[%s2395_s9 + $0xc8] sm:$0xff] }
 0x1bc   : > { %843 = vmatpush.msrb.mxu2 %v808_v59  ;;  %897 = vmatpush.msra.mxu3 %v877_v31 }
 0x1be   : > { %844 = vmatpush.msrb.mxu2 %v807_v61  ;;  %898 = vmatpush.msra.mxu3 %v876_v32 }
 0x1c0   : > { %845 = vmatpush.msrb.mxu2 %v806_v63  ;;  %899 = vmatpush.msra.mxu3 %v875_v33 }
 0x1c2   : > { %846 = vmatpush.msrb.mxu2 %v805_v5  ;;  %900 = vmatpush.msra.mxu3 %v874_v34 }
 0x1c4   : > { %847 = vmatpush.msrb.mxu2 %v804_v7  ;;  %962 = vmatpush.msrb.mxu3 %v944_v53 }
 0x1c6   : > { %848 = vmatpush.msrb.mxu2 %v803_v9  ;;  %963 = vmatpush.msrb.mxu3 %v943_v54 }
 0x1c8   : > { %849 = vmatpush.msrb.mxu2 %v802_v11 }
 0x1ca   : > { %850 = vmatpush.msrb.mxu2 %v801_v13  ;;  %v1606_v13 = vld [vmem:[%s2394_s8 + $0x6] sm:$0x3] }
 0x1cc   : > { %851 = vmatpush.msrb.mxu2 %v800_v15  ;;  %v1603_v15 = vld [vmem:[%s2394_s8 + $0x4] sm:$0x3] }
 0x1ce   : > { %852 = vmatpush.msrb.mxu2 %v799_v17  ;;  %v1132_v17 = vld [vmem:[%s2395_s9 + $0x78] sm:$0xff] }
 0x1d0   : > { %853 = vmatpush.msrb.mxu2 %v798_v19  ;;  %v1131_v19 = vld [vmem:[%s2395_s9 + $0x70] sm:$0xff] }
 0x1d2   : > { %854 = vmatpush.msrb.mxu2 %v797_v21  ;;  %v1130_v21 = vld [vmem:[%s2395_s9 + $0x68] sm:$0xff] }
 0x234   : > { %v715_v1 = vpop.f32.mrf.mxu3  ;;  %v688_v2 = vpop.f32.mrf.mxu2 }
 0x235   : > { %719 = vrot.lane.b32.xlu1 %v715_v1, %s2402_s22  ;;  %692 = vst.msk [vmem:[#allocation3] sm:$0xf] %vm691_vm8, %v688_v2 }
 0x23c   : > { %v772_v3 = vpop.f32.mrf.mxu3  ;;  %v746_v4 = vpop.f32.mrf.mxu2 }
 0x23d   : > { %776 = vrot.lane.b32.xlu2 %v772_v3, %s2402_s22  ;;  %749 = vst.msk [vmem:[#allocation3 + $0x4] sm:$0xf] %vm691_vm8, %v746_v4  ;;  %s460_s22 = scalar_lea.vmem [#allocation6], %s1576_s27  ;;  %s1695_s27 = scalar_lea.hbm %s2400_s14, 4 }
 0x23e   : > { %s1510_s15 = sshll.u32 %s460_s22, 4  ;;  %p1697_p1 = scmp.lt.s32.totalorder %s1695_s27, %s1691_s2  ;;  %s1511_s15 = int_to_ptr.vmem [resolvable:$true] %s1510_s15 }
 0x240   : > { %p1698_p2 = por %p1697_p1, %p1696_p0 }
 0x242   : > { %p1699_p3 = pnand %p1698_p2, %p1694_p13 }
 0x297   : > { %v777_v22 = vpop.permute.xlu2 %776 }
 0x298   : > { %779 = vst.msk [vmem:[#allocation3 + $0x4] sm:$0xf] %vm722_vm9, %v777_v22  ;;  %v1146_v22 = vld [vmem:[%s2395_s9 + $0xe8] sm:$0xff] }
 0x2a7   : > { %v720_v23 = vpop.permute.xlu1 %719 }
 0x2a8   : > { %723 = vst.msk [vmem:[#allocation3] sm:$0xf] %vm722_vm9, %v720_v23  ;;  %v1129_v23 = vld [vmem:[%s2395_s9 + $0x60] sm:$0xff]  ;;  %vm1338_vm9 = vcmask 15360  }
 0x2af   : > { %v780_v24 = vld [vmem:[#allocation3] sm:$0xff] }
 0x2b0   : > { %814 = vst [vmem:[#allocation1] ss:$2 sm:$0xff] %v780_v24  ;;  %v1145_v24 = vld [vmem:[%s2395_s9 + $0xe0] sm:$0xff] }
 0x2b7   : > { %v815_v25 = vld.sshfl [vmem:[#allocation1] sm:$0xff pattern:$0x75316420]  ;;  %v816_v26 = vld.sshfl [vmem:[#allocation1 + $0x8] sm:$0xff pattern:$0x75316420] }
 0x2b8   : > { %835 = vmatmul.f32.vlgmr.msrb.gmra.mxu1 %v815_v25  ;;  %855 = vmatmul.f32.vlgmr.msrb.gmra.mxu2 %v816_v26  ;;  %v1128_v25 = vld [vmem:[%s2395_s9 + $0x58] sm:$0xff] }
 0x2b9   : > { %v1144_v26 = vld [vmem:[%s2395_s9 + $0xd8] sm:$0xff] }
 0x335   : > { %v836_v35 = vpop.f32.mrf.mxu1 }
 0x33b   : > { %v856_v36 = vpop.f32.mrf.mxu2 }
 0x33c   : > { %v857_v37 = vadd.f32 %v856_v36, %v836_v35  ;;  %v1141_v35 = vld [vmem:[%s2395_s9 + $0xc0] sm:$0xff] }
 0x33d   : > { %v1125_v36 = vld [vmem:[%s2395_s9 + $0x40] sm:$0xff] }
 0x33e   : > { %v859_v38 = vsel %vm691_vm8, %v857_v37, 0.0  ;;  %v866_v39 = vmul.f32 %v857_v37, %v857_v37 }
 0x33f   : > { %v860_v40 = vrot.slane %v859_v38, 4 }
 0x340   : > { %v867_v41 = vsel %vm691_vm8, %v866_v39, 0.0  ;;  %vm1342_vm8 = vcmask 1041408  }
 0x341   : > { %v861_v42 = vadd.f32 %v860_v40, %v859_v38  ;;  %v868_v43 = vrot.slane %v867_v41, 4  ;;  %v1140_v38 = vld [vmem:[%s2395_s9 + $0xb8] sm:$0xff]  ;;  %v1123_v40 = vld [vmem:[%s2395_s9 + $0x30] sm:$0xff] }
 0x343   : > { %v862_v44 = vrot.slane %v861_v42, 2  ;;  %v869_v45 = vadd.f32 %v868_v43, %v867_v41  ;;  %v1139_v41 = vld [vmem:[%s2395_s9 + $0xb0] sm:$0xff]  ;;  %v1138_v43 = vld [vmem:[%s2395_s9 + $0xa8] sm:$0xff] }
 0x345   : > { %v863_v46 = vadd.f32 %v862_v44, %v861_v42  ;;  %v870_v47 = vrot.slane %v869_v45, 2  ;;  %v1122_v42 = vld [vmem:[%s2395_s9 + $0x28] sm:$0xff]  ;;  %v1121_v44 = vld [vmem:[%s2395_s9 + $0x20] sm:$0xff] }
 0x347   : > { %v864_v48 = vrot.slane %v863_v46, 1  ;;  %v871_v49 = vadd.f32 %v870_v47, %v869_v45  ;;  %v1137_v45 = vld [vmem:[%s2395_s9 + $0xa0] sm:$0xff]  ;;  %v1136_v47 = vld [vmem:[%s2395_s9 + $0x98] sm:$0xff] }
 0x349   : > { %v865_v50 = vadd.f32 %v864_v48, %v863_v46  ;;  %v872_v51 = vrot.slane %v871_v49, 1  ;;  %v1120_v46 = vld [vmem:[%s2395_s9 + $0x18] sm:$0xff]  ;;  %v1119_v48 = vld [vmem:[%s2395_s9 + $0x10] sm:$0xff] }
 0x34b   : > { %1594 = vmatmul.msk.f32.vlgmr.msra.gmra.mxu3 %vm619_vm5, %v865_v50  ;;  %v873_v52 = vadd.f32 %v872_v51, %v871_v49  ;;  %v1135_v49 = vld [vmem:[%s2395_s9 + $0x90] sm:$0xff]  ;;  %v1118_v50 = vld [vmem:[%s2395_s9 + $0x8] sm:$0xff] }
 0x34c   : > { %985 = vmatpush.msra.mxu3 %v944_v53  ;;  %v1134_v51 = vld [vmem:[%s2395_s9 + $0x88] sm:$0xff]  ;;  %v1133_v53 = vld [vmem:[%s2395_s9 + $0x80] sm:$0xff] }
 0x34d   : > { %1595 = vmatmul.msk.f32.vlgmr.msra.gmra.mxu0 %vm619_vm5, %v873_v52  ;;  %v1117_v52 = vld [vmem:[%s2395_s9] sm:$0xff] }
 0x34e   : > { %986 = vmatpush.msra.mxu3 %v943_v54 }
 0x3ca   : > { %v926_v55 = vpop.f32.mrf.mxu0 }
 0x3cb   : > { %v929_v58 = vmul.f32 0.0625, %v926_v55 }
 0x3ce   : > { %v902_v56 = vpop.f32.mrf.mxu3 }
 0x3cf   : > { %v905_v57 = vmul.f32 0.0625, %v902_v56 }
 0x3d1   : > { %v930_v59 = vmul.f32 %v905_v57, %v905_v57  ;;  %1596 = vmatmul.msk.f32.vlgmr.msrb.gmra.mxu3 %vm469_vm0, %v905_v57 }
 0x3d3   : > { %v931_v60 = vsub.f32 %v929_v58, %v930_v59  ;;  %v1217_v58 = vld [vmem:[%s2396_s10 + $0x38] sm:$0xff]  ;;  %v1216_v59 = vld [vmem:[%s2396_s10 + $0x30] sm:$0xff] }
 0x3d5   : > { %v932_v61 = vadd.f32 1e-05, %v931_v60  ;;  %v1215_v60 = vld [vmem:[%s2396_s10 + $0x28] sm:$0xff] }
 0x3d7   : > { %1671 = vrsqrt.f32 %v932_v61  ;;  %vm939_vm11 = vweird.f32 %v932_v61 }
 0x3dd   : > { %v1672_v62 = vpop.eup %1671 }
 0x3de   : > { %v934_v63 = vmul.f32 %v1672_v62, %v932_v61  ;;  %vm940_vm10 = vweird.f32 %v1672_v62  ;;  %v1214_v61 = vld [vmem:[%s2396_s10 + $0x20] sm:$0xff] }
 0x3df   : > { %vm941_vm12 = vmor %vm939_vm11, %vm940_vm10  ;;  %vm1495_vm10 = vcmask 9216  }
 0x3e0   : > { %v935_v0 = vmul.f32 %v1672_v62, %v934_v63  ;;  %v1212_v63 = vld [vmem:[%s2396_s10 + $0x10] sm:$0xff] }
 0x3e2   : > { %v936_v1 = vmul.f32 0.5, %v935_v0  ;;  %v1211_v0 = vld [vmem:[%s2396_s10 + $0x8] sm:$0xff] }
 0x3e4   : > { %v937_v2 = vsub.f32 1.5, %v936_v1  ;;  %v1210_v1 = vld [vmem:[%s2396_s10] sm:$0xff] }
 0x3e6   : > { %v938_v3 = vmul.f32 %v1672_v62, %v937_v2  ;;  %v1282_v2 = vld [vmem:[%s2397_s11 + $0x18] sm:$0xff] }
 0x3e8   : > { %v942_v4 = vsel %vm941_vm12, %v1672_v62, %v938_v3  ;;  %v1213_v62 = vld [vmem:[%s2396_s10 + $0x18] sm:$0xff]  ;;  %v1281_v3 = vld [vmem:[%s2397_s11 + $0x10] sm:$0xff] }
 0x3e9   : > { %1597 = vmatmul.msk.f32.vlgmr.msra.gmra.mxu3 %vm469_vm0, %v942_v4  ;;  %vm1027_vm0 = vcmask 517120  }
 0x454   : > { %v965_v5 = vpop.f32.mrf.mxu3 }
 0x455   : > { %v991_v6 = vperm.slane %v965_v5, 0 }
 0x457   : > { %v992_v8 = vsub.f32 %v857_v37, %v991_v6  ;;  %v1124_v37 = vld [vmem:[%s2395_s9 + $0x38] sm:$0xff] }
 0x46c   : > { %v988_v7 = vpop.f32.mrf.mxu3 }
 0x46d   : > { %v993_v9 = vperm.slane %v988_v7, 0 }
 0x46f   : > { %v994_v10 = vmul.f32 %v993_v9, %v992_v8 }
 0x471   : > { %vm995_vm13 = vcmp.gt.f32.partialorder %v994_v10, 0.0  ;;  %v996_v11 = vmul.f32 0.2, %v994_v10 }
 0x473   : > { %v997_v12 = vsel %vm995_vm13, %v994_v10, %v996_v11 }
 0x474   : > { %1598 = vmatpush.msk.msrb.mxu0 %vm1003_vm14, %v997_v12  ;;  %1601 = vmatpush.msk.msra.mxu1 %vm1003_vm14, %v997_v12 }
 0x475   : > { %1604 = vmatpush.msk.msra.mxu2 %vm1003_vm14, %v997_v12  ;;  %1607 = vmatpush.msk.msrb.mxu3 %vm1003_vm14, %v997_v12 }
 0x476   : > { %1608 = vmatmul.msk.f32.vlgmr.msrb.gmra.mxu3 %vm999_vm15, %v1606_v13  ;;  %1602 = vmatmul.msk.f32.vlgmr.msra.gmra.mxu1 %vm999_vm15, %v1600_v14 }
 0x477   : > { %1605 = vmatmul.msk.f32.vlgmr.msra.gmra.mxu2 %vm999_vm15, %v1603_v15  ;;  %1599 = vmatmul.msk.f32.vlgmr.msrb.gmra.mxu0 %vm999_vm15, %v998_v16 }
 0x478   : > { %1155 = vmatpush.msra.mxu0 %v1132_v17  ;;  %1175 = vmatpush.msrb.mxu1 %v1148_v18 }
 0x479   : > { %1229 = vmatpush.msrb.mxu2 %v1217_v58  ;;  %1253 = vmatpush.msra.mxu3 %v1217_v58 }
 0x47a   : > { %1156 = vmatpush.msra.mxu0 %v1131_v19  ;;  %1176 = vmatpush.msrb.mxu1 %v1147_v20 }
 0x47b   : > { %1230 = vmatpush.msrb.mxu2 %v1216_v59  ;;  %1254 = vmatpush.msra.mxu3 %v1216_v59 }
 0x47c   : > { %1157 = vmatpush.msra.mxu0 %v1130_v21  ;;  %1177 = vmatpush.msrb.mxu1 %v1146_v22  ;;  %v1280_v22 = vld [vmem:[%s2397_s11 + $0x8] sm:$0xff] }
 0x47d   : > { %1231 = vmatpush.msrb.mxu2 %v1215_v60  ;;  %1255 = vmatpush.msra.mxu3 %v1215_v60  ;;  %v1431_v60 = vld [vmem:[%s2399_s13 + $0x38] sm:$0xff] }
 0x47e   : > { %1158 = vmatpush.msra.mxu0 %v1129_v23  ;;  %1178 = vmatpush.msrb.mxu1 %v1145_v24  ;;  %v1279_v23 = vld [vmem:[%s2397_s11] sm:$0xff] }
 0x47f   : > { %1232 = vmatpush.msrb.mxu2 %v1214_v61  ;;  %1256 = vmatpush.msra.mxu3 %v1214_v61  ;;  %v1447_v61 = vld [vmem:[%s2399_s13 + $0xb8] sm:$0xff] }
 0x480   : > { %1159 = vmatpush.msra.mxu0 %v1128_v25  ;;  %1179 = vmatpush.msrb.mxu1 %v1144_v26 }
 0x481   : > { %1233 = vmatpush.msrb.mxu2 %v1213_v62  ;;  %1257 = vmatpush.msra.mxu3 %v1213_v62  ;;  %v1430_v62 = vld [vmem:[%s2399_s13 + $0x30] sm:$0xff] }
 0x482   : > { %1160 = vmatpush.msra.mxu0 %v1127_v27  ;;  %1180 = vmatpush.msrb.mxu1 %v1143_v28 }
 0x483   : > { %1234 = vmatpush.msrb.mxu2 %v1212_v63  ;;  %1258 = vmatpush.msra.mxu3 %v1212_v63  ;;  %v1446_v63 = vld [vmem:[%s2399_s13 + $0xb0] sm:$0xff] }
 0x484   : > { %1161 = vmatpush.msra.mxu0 %v1126_v29  ;;  %1181 = vmatpush.msrb.mxu1 %v1142_v30 }
 0x485   : > { %1235 = vmatpush.msrb.mxu2 %v1211_v0  ;;  %1259 = vmatpush.msra.mxu3 %v1211_v0  ;;  %v1429_v0 = vld [vmem:[%s2399_s13 + $0x28] sm:$0xff] }
 0x486   : > { %1182 = vmatpush.msrb.mxu1 %v1141_v35  ;;  %1162 = vmatpush.msra.mxu0 %v1125_v36 }
 0x487   : > { %1236 = vmatpush.msrb.mxu2 %v1210_v1  ;;  %1260 = vmatpush.msra.mxu3 %v1210_v1  ;;  %v1445_v1 = vld [vmem:[%s2399_s13 + $0xa8] sm:$0xff] }
 0x488   : > { %1163 = vmatpush.msra.mxu0 %v1124_v37  ;;  %1183 = vmatpush.msrb.mxu1 %v1140_v38 }
 0x489   : > { %1299 = vmatpush.msra.mxu2 %v1282_v2  ;;  %1322 = vmatpush.msrb.mxu3 %v1282_v2  ;;  %v1428_v2 = vld [vmem:[%s2399_s13 + $0x20] sm:$0xff] }
 0x48a   : > { %1164 = vmatpush.msra.mxu0 %v1123_v40  ;;  %1184 = vmatpush.msrb.mxu1 %v1139_v41 }
 0x48b   : > { %1300 = vmatpush.msra.mxu2 %v1281_v3  ;;  %1323 = vmatpush.msrb.mxu3 %v1281_v3  ;;  %v1444_v3 = vld [vmem:[%s2399_s13 + $0xa0] sm:$0xff] }
 0x48c   : > { %1165 = vmatpush.msra.mxu0 %v1122_v42  ;;  %1185 = vmatpush.msrb.mxu1 %v1138_v43 }
 0x48d   : > { %1301 = vmatpush.msra.mxu2 %v1280_v22  ;;  %1324 = vmatpush.msrb.mxu3 %v1280_v22 }
 0x48e   : > { %1166 = vmatpush.msra.mxu0 %v1121_v44  ;;  %1186 = vmatpush.msrb.mxu1 %v1137_v45  ;;  %v1615_v45 = vld [vmem:[%s2398_s12 + $0x2] sm:$0x3] }
 0x48f   : > { %1302 = vmatpush.msra.mxu2 %v1279_v23  ;;  %1325 = vmatpush.msrb.mxu3 %v1279_v23 }
 0x490   : > { %1167 = vmatpush.msra.mxu0 %v1120_v46  ;;  %1187 = vmatpush.msrb.mxu1 %v1136_v47  ;;  %v1337_v47 = vld [vmem:[%s2398_s12] sm:$0x3] }
 0x492   : > { %1168 = vmatpush.msra.mxu0 %v1119_v48  ;;  %1188 = vmatpush.msrb.mxu1 %v1135_v49  ;;  %v1618_v48 = vld [vmem:[%s2398_s12 + $0x4] sm:$0x3]  ;;  %v1439_v49 = vld [vmem:[%s2399_s13 + $0x78] sm:$0xff] }
 0x494   : > { %1169 = vmatpush.msra.mxu0 %v1118_v50  ;;  %1189 = vmatpush.msrb.mxu1 %v1134_v51  ;;  %v1438_v50 = vld [vmem:[%s2399_s13 + $0x70] sm:$0xff]  ;;  %v1437_v51 = vld [vmem:[%s2399_s13 + $0x68] sm:$0xff] }
 0x496   : > { %1170 = vmatpush.msra.mxu0 %v1117_v52  ;;  %1190 = vmatpush.msrb.mxu1 %v1133_v53  ;;  %v1436_v52 = vld [vmem:[%s2399_s13 + $0x60] sm:$0xff]  ;;  %v1435_v53 = vld [vmem:[%s2399_s13 + $0x58] sm:$0xff] }
 0x498   : > { %1455 = vmatpush.msra.mxu1 %v1439_v49 }
 0x49a   : > { %1456 = vmatpush.msra.mxu1 %v1438_v50 }
 0x49c   : > { %1457 = vmatpush.msra.mxu1 %v1437_v51 }
 0x49e   : > { %1458 = vmatpush.msra.mxu1 %v1436_v52 }
 0x4a0   : > { %1459 = vmatpush.msra.mxu1 %v1435_v53 }
 0x4f3   : > { %v1051_v31 = vpop.f32.mrf.mxu1 }
 0x4f4   : > { %1055 = vrot.lane.b32.xlu2 %v1051_v31, %s2414_s18  ;;  %v1024_v32 = vpop.f32.mrf.mxu0 }
 0x4f5   : > { %1028 = vst.msk [vmem:[#allocation4] sm:$0x3] %vm1027_vm0, %v1024_v32 }
 0x4f9   : > { %v1108_v33 = vpop.f32.mrf.mxu3 }
 0x4fa   : > { %1112 = vrot.lane.b32.xlu0 %v1108_v33, %s2414_s18  ;;  %v1082_v34 = vpop.f32.mrf.mxu2 }
 0x4fb   : > { %1085 = vst.msk [vmem:[#allocation4 + $0x2] sm:$0x3] %vm1027_vm0, %v1082_v34 }
 0x54e   : > { %v1056_v39 = vpop.permute.xlu2 %1055 }
 0x54f   : > { %1059 = vst.msk [vmem:[#allocation4] sm:$0x3] %vm1058_vm1, %v1056_v39 }
 0x56c   : > { %v1113_v54 = vpop.permute.xlu0 %1112 }
 0x56d   : > { %1115 = vst.msk [vmem:[#allocation4 + $0x2] sm:$0x3] %vm1058_vm1, %v1113_v54  ;;  %v1434_v54 = vld [vmem:[%s2399_s13 + $0x50] sm:$0xff] }
 0x56e   : > { %1460 = vmatpush.msra.mxu1 %v1434_v54 }
 0x574   : > { %v1116_v55 = vld [vmem:[#allocation4] sm:$0xf] }
 0x575   : > { %1150 = vst [vmem:[#allocation1] ss:$4 sm:$0xff] %v1116_v55  ;;  %v1433_v55 = vld [vmem:[%s2399_s13 + $0x48] sm:$0xff] }
 0x576   : > { %1461 = vmatpush.msra.mxu1 %v1433_v55 }
 0x57c   : > { %v1151_v56 = vld.sshfl [vmem:[#allocation1] sm:$0xff pattern:$0x73625140]  ;;  %v1152_v57 = vld.sshfl [vmem:[#allocation1 + $0x8] sm:$0xff pattern:$0x73625140] }
 0x57d   : > { %1171 = vmatmul.f32.vlgmr.msra.gmra.mxu0 %v1151_v56  ;;  %1191 = vmatmul.f32.vlgmr.msrb.gmra.mxu1 %v1152_v57  ;;  %v1432_v56 = vld [vmem:[%s2399_s13 + $0x40] sm:$0xff] }
 0x57e   : > { %1462 = vmatpush.msra.mxu1 %v1432_v56 }
 0x580   : > { %1463 = vmatpush.msra.mxu1 %v1431_v60 }
 0x582   : > { %1464 = vmatpush.msra.mxu1 %v1430_v62 }
 0x584   : > { %1465 = vmatpush.msra.mxu1 %v1429_v0 }
 0x586   : > { %1466 = vmatpush.msra.mxu1 %v1428_v2 }
 0x5fa   : > { %v1172_v4 = vpop.f32.mrf.mxu0  ;;  %v1192_v5 = vpop.f32.mrf.mxu1 }
 0x5fb   : > { %v1193_v6 = vadd.f32 %v1192_v5, %v1172_v4  ;;  %v1427_v4 = vld [vmem:[%s2399_s13 + $0x18] sm:$0xff] }
 0x5fc   : > { %v1443_v5 = vld [vmem:[%s2399_s13 + $0x98] sm:$0xff]  ;;  %1467 = vmatpush.msra.mxu1 %v1427_v4 }
 0x5fd   : > { %v1195_v7 = vsel %vm1027_vm0, %v1193_v6, 0.0  ;;  %v1202_v8 = vmul.f32 %v1193_v6, %v1193_v6 }
 0x5fe   : > { %v1196_v9 = vrot.slane %v1195_v7, 4 }
 0x5ff   : > { %v1203_v10 = vsel %vm1027_vm0, %v1202_v8, 0.0  ;;  %v1425_v8 = vld [vmem:[%s2399_s13 + $0x8] sm:$0xff] }
 0x600   : > { %v1197_v11 = vadd.f32 %v1196_v9, %v1195_v7  ;;  %v1204_v12 = vrot.slane %v1203_v10, 4  ;;  %v1442_v7 = vld [vmem:[%s2399_s13 + $0x90] sm:$0xff]  ;;  %v1441_v9 = vld [vmem:[%s2399_s13 + $0x88] sm:$0xff] }
 0x602   : > { %v1198_v13 = vrot.slane %v1197_v11, 2  ;;  %v1205_v14 = vadd.f32 %v1204_v12, %v1203_v10  ;;  %v1424_v10 = vld [vmem:[%s2399_s13] sm:$0xff] }
 0x604   : > { %v1199_v15 = vadd.f32 %v1198_v13, %v1197_v11  ;;  %v1206_v16 = vrot.slane %v1205_v14, 2  ;;  %v1440_v11 = vld [vmem:[%s2399_s13 + $0x80] sm:$0xff] }
 0x606   : > { %v1200_v17 = vrot.slane %v1199_v15, 1  ;;  %v1207_v18 = vadd.f32 %v1206_v16, %v1205_v14 }
 0x608   : > { %v1201_v19 = vadd.f32 %v1200_v17, %v1199_v15  ;;  %v1208_v20 = vrot.slane %v1207_v18, 1 }
 0x60a   : > { %1609 = vmatmul.msk.f32.vlgmr.msrb.gmra.mxu2 %vm619_vm5, %v1201_v19  ;;  %v1209_v21 = vadd.f32 %v1208_v20, %v1207_v18 }
 0x60c   : > { %1610 = vmatmul.msk.f32.vlgmr.msra.gmra.mxu3 %vm619_vm5, %v1209_v21 }
 0x68d   : > { %v1238_v24 = vpop.f32.mrf.mxu2 }
 0x68e   : > { %v1241_v25 = vmul.f32 0.25, %v1238_v24 }
 0x68f   : > { %v1262_v26 = vpop.f32.mrf.mxu3 }
 0x690   : > { %v1266_v27 = vmul.f32 %v1241_v25, %v1241_v25  ;;  %v1265_v28 = vmul.f32 0.25, %v1262_v26  ;;  %1611 = vmatmul.msk.f32.vlgmr.msra.gmra.mxu2 %vm1283_vm2, %v1241_v25 }
 0x692   : > { %v1267_v29 = vsub.f32 %v1265_v28, %v1266_v27 }
 0x694   : > { %v1268_v30 = vadd.f32 1e-05, %v1267_v29 }
 0x696   : > { %1673 = vrsqrt.f32 %v1268_v30  ;;  %vm1275_vm4 = vweird.f32 %v1268_v30 }
 0x69c   : > { %v1674_v31 = vpop.eup %1673 }
 0x69d   : > { %v1270_v32 = vmul.f32 %v1674_v31, %v1268_v30  ;;  %vm1276_vm3 = vweird.f32 %v1674_v31 }
 0x69e   : > { %vm1277_vm6 = vmor %vm1275_vm4, %vm1276_vm3 }
 0x69f   : > { %v1271_v33 = vmul.f32 %v1674_v31, %v1270_v32 }
 0x6a1   : > { %v1272_v34 = vmul.f32 0.5, %v1271_v33 }
 0x6a3   : > { %v1273_v35 = vsub.f32 1.5, %v1272_v34 }
 0x6a5   : > { %v1274_v36 = vmul.f32 %v1674_v31, %v1273_v35 }
 0x6a7   : > { %v1278_v37 = vsel %vm1277_vm6, %v1674_v31, %v1274_v36 }
 0x6a8   : > { %1612 = vmatmul.msk.f32.vlgmr.msrb.gmra.mxu3 %vm1283_vm2, %v1278_v37 }
 0x713   : > { %v1304_v38 = vpop.f32.mrf.mxu2 }
 0x714   : > { %v1330_v39 = vperm.slane %v1304_v38, 0 }
 0x716   : > { %v1331_v41 = vsub.f32 %v1193_v6, %v1330_v39  ;;  %v1426_v6 = vld [vmem:[%s2399_s13 + $0x10] sm:$0xff] }
 0x717   : > { %1468 = vmatpush.msra.mxu1 %v1426_v6 }
 0x719   : > { %1469 = vmatpush.msra.mxu1 %v1425_v8 }
 0x71b   : > { %1470 = vmatpush.msra.mxu1 %v1424_v10 }
 0x72b   : > { %v1327_v40 = vpop.f32.mrf.mxu3 }
 0x72c   : > { %v1332_v42 = vperm.slane %v1327_v40, 0 }
 0x72e   : > { %v1333_v43 = vmul.f32 %v1332_v42, %v1331_v41 }
 0x730   : > { %vm1334_vm7 = vcmp.gt.f32.partialorder %v1333_v43, 0.0  ;;  %v1335_v44 = vmul.f32 0.2, %v1333_v43 }
 0x732   : > { %v1336_v46 = vsel %vm1334_vm7, %v1333_v43, %v1335_v44 }
 0x733   : > { %1613 = vmatpush.msk.msrb.mxu2 %vm1342_vm8, %v1336_v46  ;;  %1616 = vmatpush.msk.msra.mxu3 %vm1342_vm8, %v1336_v46 }
 0x734   : > { %1619 = vmatpush.msk.msrb.mxu0 %vm1342_vm8, %v1336_v46  ;;  %1617 = vmatmul.msk.f32.vlgmr.msra.gmra.mxu3 %vm1338_vm9, %v1615_v45 }
 0x735   : > { %1614 = vmatmul.msk.f32.vlgmr.msrb.gmra.mxu2 %vm1338_vm9, %v1337_v47  ;;  %1620 = vmatmul.msk.f32.vlgmr.msrb.gmra.mxu0 %vm1338_vm9, %v1618_v48 }
 0x736   : > { %1483 = vmatpush.msra.mxu2 %v1447_v61 }
 0x738   : > { %1484 = vmatpush.msra.mxu2 %v1446_v63 }
 0x73a   : > { %1485 = vmatpush.msra.mxu2 %v1445_v1 }
 0x73c   : > { %1486 = vmatpush.msra.mxu2 %v1444_v3 }
 0x73e   : > { %1487 = vmatpush.msra.mxu2 %v1443_v5 }
 0x740   : > { %1488 = vmatpush.msra.mxu2 %v1442_v7 }
 0x742   : > { %1489 = vmatpush.msra.mxu2 %v1441_v9 }
 0x744   : > { %1490 = vmatpush.msra.mxu2 %v1440_v11 }
 0x7b2   : > { %v1419_v57 = vpop.f32.mrf.mxu0 }
 0x7b3   : > { %1422 = vst.msk [vmem:[#allocation5 + $0x2] sm:$0x3] %vm1027_vm0, %v1419_v57 }
 0x7b7   : > { %v1389_v58 = vpop.f32.mrf.mxu3 }
 0x7b8   : > { %1393 = vrot.lane.b32.xlu1 %v1389_v58, %s2414_s18  ;;  %v1363_v59 = vpop.f32.mrf.mxu2  ;;  %s1498_s18 = scalar_lea.sflag [#allocation7], %s458_s25 }
 0x7b9   : > { %1366 = vst.msk [vmem:[#allocation5] sm:$0x3] %vm1027_vm0, %v1363_v59 }
 0x82a   : > { %v1394_v12 = vpop.permute.xlu1 %1393 }
 0x82b   : > { %1396 = vst.msk [vmem:[#allocation5] sm:$0x3] %vm1058_vm1, %v1394_v12 }
 0x832   : > { %v1423_v13 = vld [vmem:[#allocation5] sm:$0xf] }
 0x833   : > { %1449 = vst [vmem:[#allocation1] ss:$4 sm:$0xff] %v1423_v13 }
 0x83a   : > { %v1450_v14 = vld.sshfl [vmem:[#allocation1] sm:$0xff pattern:$0x73625140]  ;;  %v1451_v15 = vld.sshfl [vmem:[#allocation1 + $0x8] sm:$0xff pattern:$0x73625140] }
 0x83b   : > { %1471 = vmatmul.f32.vlgmr.msra.gmra.mxu1 %v1450_v14  ;;  %1621 = vmatmul.msk.f32.vlgmr.msra.gmra.mxu2 %vm619_vm5, %v1451_v15 }
 0x8b8   : > { %v1472_v16 = vpop.f32.mrf.mxu1 }
 0x8be   : > { %v1492_v17 = vpop.f32.mrf.mxu2 }
 0x8bf   : > { %v1493_v18 = vadd.f32 %v1492_v17, %v1472_v16 }
 0x8c1   : > { %1496 = vst.msk [vmem:[%s460_s22] sm:$0x3] %vm1495_vm10, %v1493_v18 }
 0x8c2   : > { %1702 = shalt.err (!%p1699_p3)
}
 0x8c3   : > { %1627 = dma.vmem_to_hbm [thread:$0]  (%p1856_p5), %s1511_s15, 32, %s1513_s20, %s1498_s18  }
 0x8c4 PF: > { %p1633_p4 = scmp.ge.s32.totalorder %s1737_s16, 2  ;;  %s1524_s25 = sand.u32 1, %s1725_s29  }
 0x8c5   : > { %s1525_s1 = scalar_lea.sflag [#allocation7], %s1524_s25 }
 0x8c6   : > { %p1630_p7 = pnand %p1633_p4, %p1860_p6 }
 0x8c8   : > { %p1631_p8 = pneg %p1630_p7 }
 0x8ca   : > { %1720 = dma.done.wait (%p1631_p8), %s1525_s1, 32  }
 0x8cb   : > { %1722 = vsyncadd (%p1631_p8), %s1525_s1, 4294967264  ;;  %s2415_s2 = sld [smem:[#allocation9_spill]]  ;;  %p24_p9 = scmp.ge.s32.totalorder %s1843_s19, 4  }
 0x8cc   : > { %s2416_s15 = sld [smem:[#allocation10_spill]]  ;;  %s2417_s29 = smov %s1729_s30 }
 0x8cd   : > { %s2419_s16 = smov %s1843_s19  ;;  %26 = sbr.rel (!%p24_p9) target bundleno = 7 (0x7), region = 122 }
 0x8d1   : > { %s2418_s30 = smov %s2415_s2 }
 0x8d2   :  { %1531 = vsyncpa [#allocation7], 1 }
 0x8d3   :  { %1533 = vsyncpa [#allocation7 + $0x1], 1 }

</bundles_post_ra>
